<compile_context>
chip_gen: v7x
topology: tpu7x:2x2x1
jax: 0.10.0
libtpu: 0.0.40
codegen_flags: <defaults>
</compile_context>

<pallas_src>
import jax
import jax.numpy as jnp
from jax.experimental import pallas as pl
from jax.experimental.pallas import tpu as pltpu


_KERNEL_SIZES = (30, 15, 5)      # conv1, conv2, conv3 (depthwise, padding='same')
_N_SCALARS = 5                   # [bn_scale, bn_shift, b1, b2, b3]
_PADL = 128                      # 128-aligned placement of the data inside scratch


# ----------------------------- Pallas kernel ------------------------------ #

def _make_kernel(B, C, T):
    CB = B * C
    tap_off = []
    o = _N_SCALARS
    for k in _KERNEL_SIZES:
        tap_off.append(o)
        o += k

    def elu(v):
        # ELU(alpha=1); clamp before exp so the unselected branch stays finite.
        return jnp.where(v > 0.0, v, jnp.exp(jnp.minimum(v, 0.0)) - 1.0)

    def kernel(x_ref, w_ref, out_ref, hp_ref):
        """x_ref: (C*B, T) row = c*B + b;  w_ref: (C*B, 55);  out_ref: (B, 3*T);
        hp_ref: (C*B, T + 2*_PADL) zero-padded scratch for the shifted taps."""
        # Zero the scratch once; the pad lanes around the data region stay zero
        # for all three convs (PyTorch 'same' zero padding).
        hp_ref[...] = jnp.zeros(hp_ref.shape, jnp.float32)

        w = w_ref[...]                                       # (CB, 55), loaded once

        # BatchNorm1d (eval), folded to per-row scale/shift.
        h = x_ref[...] * w[:, 0:1] + w[:, 1:2]               # (CB, T)

        # Depthwise 'same' convs: k shifted VPU FMAs each.
        # PyTorch 'same' (stride=1): left = (k-1)//2, right = k-1-left
        # (k=30 -> 14/15, k=15 -> 7/7, k=5 -> 2/2), cross-correlation:
        #   out[t] = sum_j w[j] * h[t + j - left]   (h zero outside [0, T)).
        for ci, k in enumerate(_KERNEL_SIZES):
            left = (k - 1) // 2
            hp_ref[:, _PADL:_PADL + T] = h                   # 128-aligned store
            acc = jnp.zeros((CB, T), jnp.float32)
            for j in range(k):                               # static unroll (~50 taps total)
                start = _PADL - left + j
                wcol = w[:, tap_off[ci] + j:tap_off[ci] + j + 1]      # (CB, 1)
                acc = acc + hp_ref[:, start:start + T] * wcol
            h = elu(acc + w[:, 2 + ci:3 + ci])               # + conv bias

        # Channel reductions on the collapsed layout (row = c*B + b).
        s = h[0:B, :]
        mx = h[0:B, :]
        for c in range(1, C):
            blk = h[c * B:(c + 1) * B, :]
            s = s + blk
            mx = jnp.maximum(mx, blk)

        # Lane-dense, 128-aligned output stores.
        out_ref[:, 0:T] = s
        out_ref[:, T:2 * T] = mx
        out_ref[:, 2 * T:3 * T] = s * (1.0 / C)

    return kernel


# --------------------------- host-side packing ----------------------------- #

def pack_params(params, B):
    """Pack BN (eval) scale/shift, conv biases and all taps into one (C*B, 55) slab.

    Row index = c*B + b (matches the kernel's collapsed activation layout).
    Computed ONCE per weight set (not per forward call).
    """
    scale = params["bn_gamma"] * jax.lax.rsqrt(params["bn_var"] + params["bn_eps"])
    shift = params["bn_beta"] - params["bn_mean"] * scale
    per_c = jnp.concatenate(
        [jnp.stack([scale, shift, params["b1"], params["b2"], params["b3"]], axis=1),
         params["w1"], params["w2"], params["w3"]],
        axis=1)                                              # (C, 5 + 30 + 15 + 5)
    return jnp.repeat(per_c, B, axis=0).astype(jnp.float32)  # (C*B, 55)


def make_srp_gp_encoder1(params, B, C, T):
    """Returns a jitted forward(x: (B, C, T) f32) -> (B, 3*T) f32."""
    # TODO(synk): training-mode BatchNorm (batch statistics) and Dropout are not
    # implemented; eval/inference semantics are used (dropout is unused in forward).
    slab = pack_params(params, B)
    kernel = _make_kernel(B, C, T)
    vmem = pl.BlockSpec(memory_space=pltpu.MemorySpace.VMEM)
    k_total = sum(_KERNEL_SIZES)

    call = pl.pallas_call(
        kernel,
        out_shape=jax.ShapeDtypeStruct((B, 3 * T), jnp.float32),
        in_specs=[vmem, vmem],
        out_specs=vmem,
        scratch_shapes=[pltpu.VMEM((B * C, T + 2 * _PADL), jnp.float32)],
        cost_estimate=pl.CostEstimate(
            flops=2 * B * C * T * (k_total + 6),
            transcendentals=3 * B * C * T,                   # ELU exps
            bytes_accessed=4 * (B * C * T + slab.size + B * 3 * T)),
    )
    # TODO(synk): for production batch sizes, add a batch-tile grid
    # (dimension_semantics=("parallel",)) so input/output DMAs pipeline and v7x's
    # two TensorCores are both used; a single block is optimal at these tiny shapes.

    @jax.jit
    def forward(x):
        x_cb = jnp.transpose(x, (1, 0, 2)).reshape(C * B, T)  # row = c*B + b
        return call(x_cb, slab)

    return forward


# --------------------------- pure-JAX reference ---------------------------- #

def reference_forward(x, params):
    B, C, T = x.shape
    eps = params["bn_eps"]
    h = (x - params["bn_mean"][None, :, None]) / jnp.sqrt(
        params["bn_var"][None, :, None] + eps)
    h = h * params["bn_gamma"][None, :, None] + params["bn_beta"][None, :, None]

    def dwconv_same(h, w, b):
        _, k = w.shape
        left = (k - 1) // 2
        right = k - 1 - left
        hp = jnp.pad(h, ((0, 0), (0, 0), (left, right)))
        out = jnp.zeros_like(h)
        for j in range(k):
            out = out + w[None, :, j:j + 1] * hp[:, :, j:j + T]
        return out + b[None, :, None]

    def elu(v):
        return jnp.where(v > 0, v, jnp.exp(jnp.minimum(v, 0.0)) - 1.0)

    h = elu(dwconv_same(h, params["w1"], params["b1"]))
    h = elu(dwconv_same(h, params["w2"], params["b2"]))
    h = elu(dwconv_same(h, params["w3"], params["b3"]))
    s = h.sum(axis=1)
    m = h.max(axis=1)
    return jnp.concatenate([s, m, s / C], axis=1)


# ----------------------------------- demo ---------------------------------- #

if __name__ == "__main__":
    # Small shapes consistent with the module: (batch, in_channels, temporal_len).
    B, C, T = 2, 4, 128

    key = jax.random.PRNGKey(0)
    kx, k0, k1, k2, k3, k4, k5, k6, k7, k8, k9 = jax.random.split(key, 11)

    x = jax.random.normal(kx, (B, C, T), jnp.float32)

    params = {
        # BatchNorm1d(in_channels) running stats / affine params (eval mode)
        "bn_gamma": 1.0 + 0.1 * jax.random.normal(k0, (C,), jnp.float32),
        "bn_beta":  0.1 * jax.random.normal(k1, (C,), jnp.float32),
        "bn_mean":  0.1 * jax.random.normal(k2, (C,), jnp.float32),
        "bn_var":   jax.random.uniform(k3, (C,), jnp.float32, 0.5, 1.5),
        "bn_eps":   1e-5,
        # depthwise conv taps (C, k) and biases (C,)
        "w1": 0.2 * jax.random.normal(k4, (C, 30), jnp.float32),
        "b1": 0.1 * jax.random.normal(k5, (C,), jnp.float32),
        "w2": 0.2 * jax.random.normal(k6, (C, 15), jnp.float32),
        "b2": 0.1 * jax.random.normal(k7, (C,), jnp.float32),
        "w3": 0.2 * jax.random.normal(k8, (C, 5), jnp.float32),
        "b3": 0.1 * jax.random.normal(k9, (C,), jnp.float32),
    }

    forward = make_srp_gp_encoder1(params, B, C, T)   # packs weights once
    y = forward(x)
    jax.block_until_ready(y)

    assert y.shape == (B, 3 * T)
    assert bool(jnp.all(jnp.isfinite(y)))

    y_ref = reference_forward(x, params)
    max_err = float(jnp.max(jnp.abs(y - y_ref)))
    assert max_err < 1e-4, f"max abs error vs reference: {max_err}"

    print("KERNEL_OK")
</pallas_src>

<mosaic_0001>
module attributes {stable_mosaic.version = 11 : i64} {
  func.func @kernel(%arg0: memref<8x128xf32, #tpu.memory_space<vmem>>, %arg1: memref<8x55xf32, #tpu.memory_space<vmem>>, %arg2: memref<2x384xf32, #tpu.memory_space<vmem>>, %arg3: memref<8x384xf32, #tpu.memory_space<vmem>>) attributes {dimension_semantics = [], scalar_prefetch = 0 : i64, scratch_operands = 1 : i64, tpu.core_type = #tpu.core_type<tc>} {
    %cst = arith.constant 0.000000e+00 : f32
    %0 = vector.broadcast %cst : f32 to vector<8x384xf32>
    %c0 = arith.constant 0 : index
    %c0_0 = arith.constant 0 : index
    %1 = vector.load %arg3[%c0, %c0_0] : memref<8x384xf32, #tpu.memory_space<vmem>>, vector<8x384xf32>
    tpu.vector_store %arg3[%c0, %c0_0], %0 {strides = array<i32>} : memref<8x384xf32, #tpu.memory_space<vmem>>, vector<8x384xf32>,
    %c0_1 = arith.constant 0 : index
    %c0_2 = arith.constant 0 : index
    %2 = vector.load %arg1[%c0_1, %c0_2] : memref<8x55xf32, #tpu.memory_space<vmem>>, vector<8x55xf32>
    %c0_3 = arith.constant 0 : index
    %c0_4 = arith.constant 0 : index
    %3 = vector.load %arg0[%c0_3, %c0_4] : memref<8x128xf32, #tpu.memory_space<vmem>>, vector<8x128xf32>
    %4 = vector.extract_strided_slice %2 {offsets = [0, 0], sizes = [8, 1], strides = [1, 1]} : vector<8x55xf32> to vector<8x1xf32>
    %5 = vector.broadcast %4 : vector<8x1xf32> to vector<8x128xf32>
    %6 = arith.mulf %3, %5 : vector<8x128xf32>
    %7 = vector.extract_strided_slice %2 {offsets = [0, 1], sizes = [8, 1], strides = [1, 1]} : vector<8x55xf32> to vector<8x1xf32>
    %8 = vector.broadcast %7 : vector<8x1xf32> to vector<8x128xf32>
    %9 = arith.addf %6, %8 : vector<8x128xf32>
    %c0_5 = arith.constant 0 : index
    %c128 = arith.constant 128 : index
    %10 = vector.load %arg3[%c0_5, %c128] : memref<8x384xf32, #tpu.memory_space<vmem>>, vector<8x128xf32>
    tpu.vector_store %arg3[%c0_5, %c128], %9 {strides = array<i32>} : memref<8x384xf32, #tpu.memory_space<vmem>>, vector<8x128xf32>,
    %cst_6 = arith.constant 0.000000e+00 : f32
    %11 = vector.broadcast %cst_6 : f32 to vector<8x128xf32>
    %12 = vector.extract_strided_slice %2 {offsets = [0, 5], sizes = [8, 1], strides = [1, 1]} : vector<8x55xf32> to vector<8x1xf32>
    %c0_7 = arith.constant 0 : index
    %c114 = arith.constant 114 : index
    %13 = vector.load %arg3[%c0_7, %c114] : memref<8x384xf32, #tpu.memory_space<vmem>>, vector<8x128xf32>
    %14 = vector.broadcast %12 : vector<8x1xf32> to vector<8x128xf32>
    %15 = arith.mulf %13, %14 : vector<8x128xf32>
    %16 = arith.addf %11, %15 : vector<8x128xf32>
    %17 = vector.extract_strided_slice %2 {offsets = [0, 6], sizes = [8, 1], strides = [1, 1]} : vector<8x55xf32> to vector<8x1xf32>
    %c0_8 = arith.constant 0 : index
    %c115 = arith.constant 115 : index
    %18 = vector.load %arg3[%c0_8, %c115] : memref<8x384xf32, #tpu.memory_space<vmem>>, vector<8x128xf32>
    %19 = vector.broadcast %17 : vector<8x1xf32> to vector<8x128xf32>
    %20 = arith.mulf %18, %19 : vector<8x128xf32>
    %21 = arith.addf %16, %20 : vector<8x128xf32>
    %22 = vector.extract_strided_slice %2 {offsets = [0, 7], sizes = [8, 1], strides = [1, 1]} : vector<8x55xf32> to vector<8x1xf32>
    %c0_9 = arith.constant 0 : index
    %c116 = arith.constant 116 : index
    %23 = vector.load %arg3[%c0_9, %c116] : memref<8x384xf32, #tpu.memory_space<vmem>>, vector<8x128xf32>
    %24 = vector.broadcast %22 : vector<8x1xf32> to vector<8x128xf32>
    %25 = arith.mulf %23, %24 : vector<8x128xf32>
    %26 = arith.addf %21, %25 : vector<8x128xf32>
    %27 = vector.extract_strided_slice %2 {offsets = [0, 8], sizes = [8, 1], strides = [1, 1]} : vector<8x55xf32> to vector<8x1xf32>
    %c0_10 = arith.constant 0 : index
    %c117 = arith.constant 117 : index
    %28 = vector.load %arg3[%c0_10, %c117] : memref<8x384xf32, #tpu.memory_space<vmem>>, vector<8x128xf32>
    %29 = vector.broadcast %27 : vector<8x1xf32> to vector<8x128xf32>
    %30 = arith.mulf %28, %29 : vector<8x128xf32>
    %31 = arith.addf %26, %30 : vector<8x128xf32>
    %32 = vector.extract_strided_slice %2 {offsets = [0, 9], sizes = [8, 1], strides = [1, 1]} : vector<8x55xf32> to vector<8x1xf32>
    %c0_11 = arith.constant 0 : index
    %c118 = arith.constant 118 : index
    %33 = vector.load %arg3[%c0_11, %c118] : memref<8x384xf32, #tpu.memory_space<vmem>>, vector<8x128xf32>
    %34 = vector.broadcast %32 : vector<8x1xf32> to vector<8x128xf32>
    %35 = arith.mulf %33, %34 : vector<8x128xf32>
    %36 = arith.addf %31, %35 : vector<8x128xf32>
    %37 = vector.extract_strided_slice %2 {offsets = [0, 10], sizes = [8, 1], strides = [1, 1]} : vector<8x55xf32> to vector<8x1xf32>
    %c0_12 = arith.constant 0 : index
    %c119 = arith.constant 119 : index
    %38 = vector.load %arg3[%c0_12, %c119] : memref<8x384xf32, #tpu.memory_space<vmem>>, vector<8x128xf32>
    %39 = vector.broadcast %37 : vector<8x1xf32> to vector<8x128xf32>
    %40 = arith.mulf %38, %39 : vector<8x128xf32>
    %41 = arith.addf %36, %40 : vector<8x128xf32>
    %42 = vector.extract_strided_slice %2 {offsets = [0, 11], sizes = [8, 1], strides = [1, 1]} : vector<8x55xf32> to vector<8x1xf32>
    %c0_13 = arith.constant 0 : index
    %c120 = arith.constant 120 : index
    %43 = vector.load %arg3[%c0_13, %c120] : memref<8x384xf32, #tpu.memory_space<vmem>>, vector<8x128xf32>
    %44 = vector.broadcast %42 : vector<8x1xf32> to vector<8x128xf32>
    %45 = arith.mulf %43, %44 : vector<8x128xf32>
    %46 = arith.addf %41, %45 : vector<8x128xf32>
    %47 = vector.extract_strided_slice %2 {offsets = [0, 12], sizes = [8, 1], strides = [1, 1]} : vector<8x55xf32> to vector<8x1xf32>
    %c0_14 = arith.constant 0 : index
    %c121 = arith.constant 121 : index
    %48 = vector.load %arg3[%c0_14, %c121] : memref<8x384xf32, #tpu.memory_space<vmem>>, vector<8x128xf32>
    %49 = vector.broadcast %47 : vector<8x1xf32> to vector<8x128xf32>
    %50 = arith.mulf %48, %49 : vector<8x128xf32>
    %51 = arith.addf %46, %50 : vector<8x128xf32>
    %52 = vector.extract_strided_slice %2 {offsets = [0, 13], sizes = [8, 1], strides = [1, 1]} : vector<8x55xf32> to vector<8x1xf32>
    %c0_15 = arith.constant 0 : index
    %c122 = arith.constant 122 : index
    %53 = vector.load %arg3[%c0_15, %c122] : memref<8x384xf32, #tpu.memory_space<vmem>>, vector<8x128xf32>
    %54 = vector.broadcast %52 : vector<8x1xf32> to vector<8x128xf32>
    %55 = arith.mulf %53, %54 : vector<8x128xf32>
    %56 = arith.addf %51, %55 : vector<8x128xf32>
    %57 = vector.extract_strided_slice %2 {offsets = [0, 14], sizes = [8, 1], strides = [1, 1]} : vector<8x55xf32> to vector<8x1xf32>
    %c0_16 = arith.constant 0 : index
    %c123 = arith.constant 123 : index
    %58 = vector.load %arg3[%c0_16, %c123] : memref<8x384xf32, #tpu.memory_space<vmem>>, vector<8x128xf32>
    %59 = vector.broadcast %57 : vector<8x1xf32> to vector<8x128xf32>
    %60 = arith.mulf %58, %59 : vector<8x128xf32>
    %61 = arith.addf %56, %60 : vector<8x128xf32>
    %62 = vector.extract_strided_slice %2 {offsets = [0, 15], sizes = [8, 1], strides = [1, 1]} : vector<8x55xf32> to vector<8x1xf32>
    %c0_17 = arith.constant 0 : index
    %c124 = arith.constant 124 : index
    %63 = vector.load %arg3[%c0_17, %c124] : memref<8x384xf32, #tpu.memory_space<vmem>>, vector<8x128xf32>
    %64 = vector.broadcast %62 : vector<8x1xf32> to vector<8x128xf32>
    %65 = arith.mulf %63, %64 : vector<8x128xf32>
    %66 = arith.addf %61, %65 : vector<8x128xf32>
    %67 = vector.extract_strided_slice %2 {offsets = [0, 16], sizes = [8, 1], strides = [1, 1]} : vector<8x55xf32> to vector<8x1xf32>
    %c0_18 = arith.constant 0 : index
    %c125 = arith.constant 125 : index
    %68 = vector.load %arg3[%c0_18, %c125] : memref<8x384xf32, #tpu.memory_space<vmem>>, vector<8x128xf32>
    %69 = vector.broadcast %67 : vector<8x1xf32> to vector<8x128xf32>
    %70 = arith.mulf %68, %69 : vector<8x128xf32>
    %71 = arith.addf %66, %70 : vector<8x128xf32>
    %72 = vector.extract_strided_slice %2 {offsets = [0, 17], sizes = [8, 1], strides = [1, 1]} : vector<8x55xf32> to vector<8x1xf32>
    %c0_19 = arith.constant 0 : index
    %c126 = arith.constant 126 : index
    %73 = vector.load %arg3[%c0_19, %c126] : memref<8x384xf32, #tpu.memory_space<vmem>>, vector<8x128xf32>
    %74 = vector.broadcast %72 : vector<8x1xf32> to vector<8x128xf32>
    %75 = arith.mulf %73, %74 : vector<8x128xf32>
    %76 = arith.addf %71, %75 : vector<8x128xf32>
    %77 = vector.extract_strided_slice %2 {offsets = [0, 18], sizes = [8, 1], strides = [1, 1]} : vector<8x55xf32> to vector<8x1xf32>
    %c0_20 = arith.constant 0 : index
    %c127 = arith.constant 127 : index
    %78 = vector.load %arg3[%c0_20, %c127] : memref<8x384xf32, #tpu.memory_space<vmem>>, vector<8x128xf32>
    %79 = vector.broadcast %77 : vector<8x1xf32> to vector<8x128xf32>
    %80 = arith.mulf %78, %79 : vector<8x128xf32>
    %81 = arith.addf %76, %80 : vector<8x128xf32>
    %82 = vector.extract_strided_slice %2 {offsets = [0, 19], sizes = [8, 1], strides = [1, 1]} : vector<8x55xf32> to vector<8x1xf32>
    %c0_21 = arith.constant 0 : index
    %c128_22 = arith.constant 128 : index
    %83 = vector.load %arg3[%c0_21, %c128_22] : memref<8x384xf32, #tpu.memory_space<vmem>>, vector<8x128xf32>
    %84 = vector.broadcast %82 : vector<8x1xf32> to vector<8x128xf32>
    %85 = arith.mulf %83, %84 : vector<8x128xf32>
    %86 = arith.addf %81, %85 : vector<8x128xf32>
    %87 = vector.extract_strided_slice %2 {offsets = [0, 20], sizes = [8, 1], strides = [1, 1]} : vector<8x55xf32> to vector<8x1xf32>
    %c0_23 = arith.constant 0 : index
    %c129 = arith.constant 129 : index
    %88 = vector.load %arg3[%c0_23, %c129] : memref<8x384xf32, #tpu.memory_space<vmem>>, vector<8x128xf32>
    %89 = vector.broadcast %87 : vector<8x1xf32> to vector<8x128xf32>
    %90 = arith.mulf %88, %89 : vector<8x128xf32>
    %91 = arith.addf %86, %90 : vector<8x128xf32>
    %92 = vector.extract_strided_slice %2 {offsets = [0, 21], sizes = [8, 1], strides = [1, 1]} : vector<8x55xf32> to vector<8x1xf32>
    %c0_24 = arith.constant 0 : index
    %c130 = arith.constant 130 : index
    %93 = vector.load %arg3[%c0_24, %c130] : memref<8x384xf32, #tpu.memory_space<vmem>>, vector<8x128xf32>
    %94 = vector.broadcast %92 : vector<8x1xf32> to vector<8x128xf32>
    %95 = arith.mulf %93, %94 : vector<8x128xf32>
    %96 = arith.addf %91, %95 : vector<8x128xf32>
    %97 = vector.extract_strided_slice %2 {offsets = [0, 22], sizes = [8, 1], strides = [1, 1]} : vector<8x55xf32> to vector<8x1xf32>
    %c0_25 = arith.constant 0 : index
    %c131 = arith.constant 131 : index
    %98 = vector.load %arg3[%c0_25, %c131] : memref<8x384xf32, #tpu.memory_space<vmem>>, vector<8x128xf32>
    %99 = vector.broadcast %97 : vector<8x1xf32> to vector<8x128xf32>
    %100 = arith.mulf %98, %99 : vector<8x128xf32>
    %101 = arith.addf %96, %100 : vector<8x128xf32>
    %102 = vector.extract_strided_slice %2 {offsets = [0, 23], sizes = [8, 1], strides = [1, 1]} : vector<8x55xf32> to vector<8x1xf32>
    %c0_26 = arith.constant 0 : index
    %c132 = arith.constant 132 : index
    %103 = vector.load %arg3[%c0_26, %c132] : memref<8x384xf32, #tpu.memory_space<vmem>>, vector<8x128xf32>
    %104 = vector.broadcast %102 : vector<8x1xf32> to vector<8x128xf32>
    %105 = arith.mulf %103, %104 : vector<8x128xf32>
    %106 = arith.addf %101, %105 : vector<8x128xf32>
    %107 = vector.extract_strided_slice %2 {offsets = [0, 24], sizes = [8, 1], strides = [1, 1]} : vector<8x55xf32> to vector<8x1xf32>
    %c0_27 = arith.constant 0 : index
    %c133 = arith.constant 133 : index
    %108 = vector.load %arg3[%c0_27, %c133] : memref<8x384xf32, #tpu.memory_space<vmem>>, vector<8x128xf32>
    %109 = vector.broadcast %107 : vector<8x1xf32> to vector<8x128xf32>
    %110 = arith.mulf %108, %109 : vector<8x128xf32>
    %111 = arith.addf %106, %110 : vector<8x128xf32>
    %112 = vector.extract_strided_slice %2 {offsets = [0, 25], sizes = [8, 1], strides = [1, 1]} : vector<8x55xf32> to vector<8x1xf32>
    %c0_28 = arith.constant 0 : index
    %c134 = arith.constant 134 : index
    %113 = vector.load %arg3[%c0_28, %c134] : memref<8x384xf32, #tpu.memory_space<vmem>>, vector<8x128xf32>
    %114 = vector.broadcast %112 : vector<8x1xf32> to vector<8x128xf32>
    %115 = arith.mulf %113, %114 : vector<8x128xf32>
    %116 = arith.addf %111, %115 : vector<8x128xf32>
    %117 = vector.extract_strided_slice %2 {offsets = [0, 26], sizes = [8, 1], strides = [1, 1]} : vector<8x55xf32> to vector<8x1xf32>
    %c0_29 = arith.constant 0 : index
    %c135 = arith.constant 135 : index
    %118 = vector.load %arg3[%c0_29, %c135] : memref<8x384xf32, #tpu.memory_space<vmem>>, vector<8x128xf32>
    %119 = vector.broadcast %117 : vector<8x1xf32> to vector<8x128xf32>
    %120 = arith.mulf %118, %119 : vector<8x128xf32>
    %121 = arith.addf %116, %120 : vector<8x128xf32>
    %122 = vector.extract_strided_slice %2 {offsets = [0, 27], sizes = [8, 1], strides = [1, 1]} : vector<8x55xf32> to vector<8x1xf32>
    %c0_30 = arith.constant 0 : index
    %c136 = arith.constant 136 : index
    %123 = vector.load %arg3[%c0_30, %c136] : memref<8x384xf32, #tpu.memory_space<vmem>>, vector<8x128xf32>
    %124 = vector.broadcast %122 : vector<8x1xf32> to vector<8x128xf32>
    %125 = arith.mulf %123, %124 : vector<8x128xf32>
    %126 = arith.addf %121, %125 : vector<8x128xf32>
    %127 = vector.extract_strided_slice %2 {offsets = [0, 28], sizes = [8, 1], strides = [1, 1]} : vector<8x55xf32> to vector<8x1xf32>
    %c0_31 = arith.constant 0 : index
    %c137 = arith.constant 137 : index
    %128 = vector.load %arg3[%c0_31, %c137] : memref<8x384xf32, #tpu.memory_space<vmem>>, vector<8x128xf32>
    %129 = vector.broadcast %127 : vector<8x1xf32> to vector<8x128xf32>
    %130 = arith.mulf %128, %129 : vector<8x128xf32>
    %131 = arith.addf %126, %130 : vector<8x128xf32>
    %132 = vector.extract_strided_slice %2 {offsets = [0, 29], sizes = [8, 1], strides = [1, 1]} : vector<8x55xf32> to vector<8x1xf32>
    %c0_32 = arith.constant 0 : index
    %c138 = arith.constant 138 : index
    %133 = vector.load %arg3[%c0_32, %c138] : memref<8x384xf32, #tpu.memory_space<vmem>>, vector<8x128xf32>
    %134 = vector.broadcast %132 : vector<8x1xf32> to vector<8x128xf32>
    %135 = arith.mulf %133, %134 : vector<8x128xf32>
    %136 = arith.addf %131, %135 : vector<8x128xf32>
    %137 = vector.extract_strided_slice %2 {offsets = [0, 30], sizes = [8, 1], strides = [1, 1]} : vector<8x55xf32> to vector<8x1xf32>
    %c0_33 = arith.constant 0 : index
    %c139 = arith.constant 139 : index
    %138 = vector.load %arg3[%c0_33, %c139] : memref<8x384xf32, #tpu.memory_space<vmem>>, vector<8x128xf32>
    %139 = vector.broadcast %137 : vector<8x1xf32> to vector<8x128xf32>
    %140 = arith.mulf %138, %139 : vector<8x128xf32>
    %141 = arith.addf %136, %140 : vector<8x128xf32>
    %142 = vector.extract_strided_slice %2 {offsets = [0, 31], sizes = [8, 1], strides = [1, 1]} : vector<8x55xf32> to vector<8x1xf32>
    %c0_34 = arith.constant 0 : index
    %c140 = arith.constant 140 : index
    %143 = vector.load %arg3[%c0_34, %c140] : memref<8x384xf32, #tpu.memory_space<vmem>>, vector<8x128xf32>
    %144 = vector.broadcast %142 : vector<8x1xf32> to vector<8x128xf32>
    %145 = arith.mulf %143, %144 : vector<8x128xf32>
    %146 = arith.addf %141, %145 : vector<8x128xf32>
    %147 = vector.extract_strided_slice %2 {offsets = [0, 32], sizes = [8, 1], strides = [1, 1]} : vector<8x55xf32> to vector<8x1xf32>
    %c0_35 = arith.constant 0 : index
    %c141 = arith.constant 141 : index
    %148 = vector.load %arg3[%c0_35, %c141] : memref<8x384xf32, #tpu.memory_space<vmem>>, vector<8x128xf32>
    %149 = vector.broadcast %147 : vector<8x1xf32> to vector<8x128xf32>
    %150 = arith.mulf %148, %149 : vector<8x128xf32>
    %151 = arith.addf %146, %150 : vector<8x128xf32>
    %152 = vector.extract_strided_slice %2 {offsets = [0, 33], sizes = [8, 1], strides = [1, 1]} : vector<8x55xf32> to vector<8x1xf32>
    %c0_36 = arith.constant 0 : index
    %c142 = arith.constant 142 : index
    %153 = vector.load %arg3[%c0_36, %c142] : memref<8x384xf32, #tpu.memory_space<vmem>>, vector<8x128xf32>
    %154 = vector.broadcast %152 : vector<8x1xf32> to vector<8x128xf32>
    %155 = arith.mulf %153, %154 : vector<8x128xf32>
    %156 = arith.addf %151, %155 : vector<8x128xf32>
    %157 = vector.extract_strided_slice %2 {offsets = [0, 34], sizes = [8, 1], strides = [1, 1]} : vector<8x55xf32> to vector<8x1xf32>
    %c0_37 = arith.constant 0 : index
    %c143 = arith.constant 143 : index
    %158 = vector.load %arg3[%c0_37, %c143] : memref<8x384xf32, #tpu.memory_space<vmem>>, vector<8x128xf32>
    %159 = vector.broadcast %157 : vector<8x1xf32> to vector<8x128xf32>
    %160 = arith.mulf %158, %159 : vector<8x128xf32>
    %161 = arith.addf %156, %160 : vector<8x128xf32>
    %162 = vector.extract_strided_slice %2 {offsets = [0, 2], sizes = [8, 1], strides = [1, 1]} : vector<8x55xf32> to vector<8x1xf32>
    %163 = vector.broadcast %162 : vector<8x1xf32> to vector<8x128xf32>
    %164 = arith.addf %161, %163 : vector<8x128xf32>
    %cst_38 = arith.constant 0.000000e+00 : f32
    %165 = vector.broadcast %cst_38 : f32 to vector<8x128xf32>
    %166 = arith.cmpf ogt, %164, %165 : vector<8x128xf32>
    %cst_39 = arith.constant 0.000000e+00 : f32
    %167 = vector.broadcast %cst_39 : f32 to vector<8x128xf32>
    %168 = arith.minimumf %164, %167 : vector<8x128xf32>
    %169 = math.exp %168 : vector<8x128xf32>
    %cst_40 = arith.constant 1.000000e+00 : f32
    %170 = vector.broadcast %cst_40 : f32 to vector<8x128xf32>
    %171 = arith.subf %169, %170 : vector<8x128xf32>
    %172 = arith.select %166, %164, %171 : vector<8x128xi1>, vector<8x128xf32>
    %c0_41 = arith.constant 0 : index
    %c128_42 = arith.constant 128 : index
    %173 = vector.load %arg3[%c0_41, %c128_42] : memref<8x384xf32, #tpu.memory_space<vmem>>, vector<8x128xf32>
    tpu.vector_store %arg3[%c0_41, %c128_42], %172 {strides = array<i32>} : memref<8x384xf32, #tpu.memory_space<vmem>>, vector<8x128xf32>,
    %cst_43 = arith.constant 0.000000e+00 : f32
    %174 = vector.broadcast %cst_43 : f32 to vector<8x128xf32>
    %175 = vector.extract_strided_slice %2 {offsets = [0, 35], sizes = [8, 1], strides = [1, 1]} : vector<8x55xf32> to vector<8x1xf32>
    %c0_44 = arith.constant 0 : index
    %c121_45 = arith.constant 121 : index
    %176 = vector.load %arg3[%c0_44, %c121_45] : memref<8x384xf32, #tpu.memory_space<vmem>>, vector<8x128xf32>
    %177 = vector.broadcast %175 : vector<8x1xf32> to vector<8x128xf32>
    %178 = arith.mulf %176, %177 : vector<8x128xf32>
    %179 = arith.addf %174, %178 : vector<8x128xf32>
    %180 = vector.extract_strided_slice %2 {offsets = [0, 36], sizes = [8, 1], strides = [1, 1]} : vector<8x55xf32> to vector<8x1xf32>
    %c0_46 = arith.constant 0 : index
    %c122_47 = arith.constant 122 : index
    %181 = vector.load %arg3[%c0_46, %c122_47] : memref<8x384xf32, #tpu.memory_space<vmem>>, vector<8x128xf32>
    %182 = vector.broadcast %180 : vector<8x1xf32> to vector<8x128xf32>
    %183 = arith.mulf %181, %182 : vector<8x128xf32>
    %184 = arith.addf %179, %183 : vector<8x128xf32>
    %185 = vector.extract_strided_slice %2 {offsets = [0, 37], sizes = [8, 1], strides = [1, 1]} : vector<8x55xf32> to vector<8x1xf32>
    %c0_48 = arith.constant 0 : index
    %c123_49 = arith.constant 123 : index
    %186 = vector.load %arg3[%c0_48, %c123_49] : memref<8x384xf32, #tpu.memory_space<vmem>>, vector<8x128xf32>
    %187 = vector.broadcast %185 : vector<8x1xf32> to vector<8x128xf32>
    %188 = arith.mulf %186, %187 : vector<8x128xf32>
    %189 = arith.addf %184, %188 : vector<8x128xf32>
    %190 = vector.extract_strided_slice %2 {offsets = [0, 38], sizes = [8, 1], strides = [1, 1]} : vector<8x55xf32> to vector<8x1xf32>
    %c0_50 = arith.constant 0 : index
    %c124_51 = arith.constant 124 : index
    %191 = vector.load %arg3[%c0_50, %c124_51] : memref<8x384xf32, #tpu.memory_space<vmem>>, vector<8x128xf32>
    %192 = vector.broadcast %190 : vector<8x1xf32> to vector<8x128xf32>
    %193 = arith.mulf %191, %192 : vector<8x128xf32>
    %194 = arith.addf %189, %193 : vector<8x128xf32>
    %195 = vector.extract_strided_slice %2 {offsets = [0, 39], sizes = [8, 1], strides = [1, 1]} : vector<8x55xf32> to vector<8x1xf32>
    %c0_52 = arith.constant 0 : index
    %c125_53 = arith.constant 125 : index
    %196 = vector.load %arg3[%c0_52, %c125_53] : memref<8x384xf32, #tpu.memory_space<vmem>>, vector<8x128xf32>
    %197 = vector.broadcast %195 : vector<8x1xf32> to vector<8x128xf32>
    %198 = arith.mulf %196, %197 : vector<8x128xf32>
    %199 = arith.addf %194, %198 : vector<8x128xf32>
    %200 = vector.extract_strided_slice %2 {offsets = [0, 40], sizes = [8, 1], strides = [1, 1]} : vector<8x55xf32> to vector<8x1xf32>
    %c0_54 = arith.constant 0 : index
    %c126_55 = arith.constant 126 : index
    %201 = vector.load %arg3[%c0_54, %c126_55] : memref<8x384xf32, #tpu.memory_space<vmem>>, vector<8x128xf32>
    %202 = vector.broadcast %200 : vector<8x1xf32> to vector<8x128xf32>
    %203 = arith.mulf %201, %202 : vector<8x128xf32>
    %204 = arith.addf %199, %203 : vector<8x128xf32>
    %205 = vector.extract_strided_slice %2 {offsets = [0, 41], sizes = [8, 1], strides = [1, 1]} : vector<8x55xf32> to vector<8x1xf32>
    %c0_56 = arith.constant 0 : index
    %c127_57 = arith.constant 127 : index
    %206 = vector.load %arg3[%c0_56, %c127_57] : memref<8x384xf32, #tpu.memory_space<vmem>>, vector<8x128xf32>
    %207 = vector.broadcast %205 : vector<8x1xf32> to vector<8x128xf32>
    %208 = arith.mulf %206, %207 : vector<8x128xf32>
    %209 = arith.addf %204, %208 : vector<8x128xf32>
    %210 = vector.extract_strided_slice %2 {offsets = [0, 42], sizes = [8, 1], strides = [1, 1]} : vector<8x55xf32> to vector<8x1xf32>
    %c0_58 = arith.constant 0 : index
    %c128_59 = arith.constant 128 : index
    %211 = vector.load %arg3[%c0_58, %c128_59] : memref<8x384xf32, #tpu.memory_space<vmem>>, vector<8x128xf32>
    %212 = vector.broadcast %210 : vector<8x1xf32> to vector<8x128xf32>
    %213 = arith.mulf %211, %212 : vector<8x128xf32>
    %214 = arith.addf %209, %213 : vector<8x128xf32>
    %215 = vector.extract_strided_slice %2 {offsets = [0, 43], sizes = [8, 1], strides = [1, 1]} : vector<8x55xf32> to vector<8x1xf32>
    %c0_60 = arith.constant 0 : index
    %c129_61 = arith.constant 129 : index
    %216 = vector.load %arg3[%c0_60, %c129_61] : memref<8x384xf32, #tpu.memory_space<vmem>>, vector<8x128xf32>
    %217 = vector.broadcast %215 : vector<8x1xf32> to vector<8x128xf32>
    %218 = arith.mulf %216, %217 : vector<8x128xf32>
    %219 = arith.addf %214, %218 : vector<8x128xf32>
    %220 = vector.extract_strided_slice %2 {offsets = [0, 44], sizes = [8, 1], strides = [1, 1]} : vector<8x55xf32> to vector<8x1xf32>
    %c0_62 = arith.constant 0 : index
    %c130_63 = arith.constant 130 : index
    %221 = vector.load %arg3[%c0_62, %c130_63] : memref<8x384xf32, #tpu.memory_space<vmem>>, vector<8x128xf32>
    %222 = vector.broadcast %220 : vector<8x1xf32> to vector<8x128xf32>
    %223 = arith.mulf %221, %222 : vector<8x128xf32>
    %224 = arith.addf %219, %223 : vector<8x128xf32>
    %225 = vector.extract_strided_slice %2 {offsets = [0, 45], sizes = [8, 1], strides = [1, 1]} : vector<8x55xf32> to vector<8x1xf32>
    %c0_64 = arith.constant 0 : index
    %c131_65 = arith.constant 131 : index
    %226 = vector.load %arg3[%c0_64, %c131_65] : memref<8x384xf32, #tpu.memory_space<vmem>>, vector<8x128xf32>
    %227 = vector.broadcast %225 : vector<8x1xf32> to vector<8x128xf32>
    %228 = arith.mulf %226, %227 : vector<8x128xf32>
    %229 = arith.addf %224, %228 : vector<8x128xf32>
    %230 = vector.extract_strided_slice %2 {offsets = [0, 46], sizes = [8, 1], strides = [1, 1]} : vector<8x55xf32> to vector<8x1xf32>
    %c0_66 = arith.constant 0 : index
    %c132_67 = arith.constant 132 : index
    %231 = vector.load %arg3[%c0_66, %c132_67] : memref<8x384xf32, #tpu.memory_space<vmem>>, vector<8x128xf32>
    %232 = vector.broadcast %230 : vector<8x1xf32> to vector<8x128xf32>
    %233 = arith.mulf %231, %232 : vector<8x128xf32>
    %234 = arith.addf %229, %233 : vector<8x128xf32>
    %235 = vector.extract_strided_slice %2 {offsets = [0, 47], sizes = [8, 1], strides = [1, 1]} : vector<8x55xf32> to vector<8x1xf32>
    %c0_68 = arith.constant 0 : index
    %c133_69 = arith.constant 133 : index
    %236 = vector.load %arg3[%c0_68, %c133_69] : memref<8x384xf32, #tpu.memory_space<vmem>>, vector<8x128xf32>
    %237 = vector.broadcast %235 : vector<8x1xf32> to vector<8x128xf32>
    %238 = arith.mulf %236, %237 : vector<8x128xf32>
    %239 = arith.addf %234, %238 : vector<8x128xf32>
    %240 = vector.extract_strided_slice %2 {offsets = [0, 48], sizes = [8, 1], strides = [1, 1]} : vector<8x55xf32> to vector<8x1xf32>
    %c0_70 = arith.constant 0 : index
    %c134_71 = arith.constant 134 : index
    %241 = vector.load %arg3[%c0_70, %c134_71] : memref<8x384xf32, #tpu.memory_space<vmem>>, vector<8x128xf32>
    %242 = vector.broadcast %240 : vector<8x1xf32> to vector<8x128xf32>
    %243 = arith.mulf %241, %242 : vector<8x128xf32>
    %244 = arith.addf %239, %243 : vector<8x128xf32>
    %245 = vector.extract_strided_slice %2 {offsets = [0, 49], sizes = [8, 1], strides = [1, 1]} : vector<8x55xf32> to vector<8x1xf32>
    %c0_72 = arith.constant 0 : index
    %c135_73 = arith.constant 135 : index
    %246 = vector.load %arg3[%c0_72, %c135_73] : memref<8x384xf32, #tpu.memory_space<vmem>>, vector<8x128xf32>
    %247 = vector.broadcast %245 : vector<8x1xf32> to vector<8x128xf32>
    %248 = arith.mulf %246, %247 : vector<8x128xf32>
    %249 = arith.addf %244, %248 : vector<8x128xf32>
    %250 = vector.extract_strided_slice %2 {offsets = [0, 3], sizes = [8, 1], strides = [1, 1]} : vector<8x55xf32> to vector<8x1xf32>
    %251 = vector.broadcast %250 : vector<8x1xf32> to vector<8x128xf32>
    %252 = arith.addf %249, %251 : vector<8x128xf32>
    %cst_74 = arith.constant 0.000000e+00 : f32
    %253 = vector.broadcast %cst_74 : f32 to vector<8x128xf32>
    %254 = arith.cmpf ogt, %252, %253 : vector<8x128xf32>
    %cst_75 = arith.constant 0.000000e+00 : f32
    %255 = vector.broadcast %cst_75 : f32 to vector<8x128xf32>
    %256 = arith.minimumf %252, %255 : vector<8x128xf32>
    %257 = math.exp %256 : vector<8x128xf32>
    %cst_76 = arith.constant 1.000000e+00 : f32
    %258 = vector.broadcast %cst_76 : f32 to vector<8x128xf32>
    %259 = arith.subf %257, %258 : vector<8x128xf32>
    %260 = arith.select %254, %252, %259 : vector<8x128xi1>, vector<8x128xf32>
    %c0_77 = arith.constant 0 : index
    %c128_78 = arith.constant 128 : index
    %261 = vector.load %arg3[%c0_77, %c128_78] : memref<8x384xf32, #tpu.memory_space<vmem>>, vector<8x128xf32>
    tpu.vector_store %arg3[%c0_77, %c128_78], %260 {strides = array<i32>} : memref<8x384xf32, #tpu.memory_space<vmem>>, vector<8x128xf32>,
    %cst_79 = arith.constant 0.000000e+00 : f32
    %262 = vector.broadcast %cst_79 : f32 to vector<8x128xf32>
    %263 = vector.extract_strided_slice %2 {offsets = [0, 50], sizes = [8, 1], strides = [1, 1]} : vector<8x55xf32> to vector<8x1xf32>
    %c0_80 = arith.constant 0 : index
    %c126_81 = arith.constant 126 : index
    %264 = vector.load %arg3[%c0_80, %c126_81] : memref<8x384xf32, #tpu.memory_space<vmem>>, vector<8x128xf32>
    %265 = vector.broadcast %263 : vector<8x1xf32> to vector<8x128xf32>
    %266 = arith.mulf %264, %265 : vector<8x128xf32>
    %267 = arith.addf %262, %266 : vector<8x128xf32>
    %268 = vector.extract_strided_slice %2 {offsets = [0, 51], sizes = [8, 1], strides = [1, 1]} : vector<8x55xf32> to vector<8x1xf32>
    %c0_82 = arith.constant 0 : index
    %c127_83 = arith.constant 127 : index
    %269 = vector.load %arg3[%c0_82, %c127_83] : memref<8x384xf32, #tpu.memory_space<vmem>>, vector<8x128xf32>
    %270 = vector.broadcast %268 : vector<8x1xf32> to vector<8x128xf32>
    %271 = arith.mulf %269, %270 : vector<8x128xf32>
    %272 = arith.addf %267, %271 : vector<8x128xf32>
    %273 = vector.extract_strided_slice %2 {offsets = [0, 52], sizes = [8, 1], strides = [1, 1]} : vector<8x55xf32> to vector<8x1xf32>
    %c0_84 = arith.constant 0 : index
    %c128_85 = arith.constant 128 : index
    %274 = vector.load %arg3[%c0_84, %c128_85] : memref<8x384xf32, #tpu.memory_space<vmem>>, vector<8x128xf32>
    %275 = vector.broadcast %273 : vector<8x1xf32> to vector<8x128xf32>
    %276 = arith.mulf %274, %275 : vector<8x128xf32>
    %277 = arith.addf %272, %276 : vector<8x128xf32>
    %278 = vector.extract_strided_slice %2 {offsets = [0, 53], sizes = [8, 1], strides = [1, 1]} : vector<8x55xf32> to vector<8x1xf32>
    %c0_86 = arith.constant 0 : index
    %c129_87 = arith.constant 129 : index
    %279 = vector.load %arg3[%c0_86, %c129_87] : memref<8x384xf32, #tpu.memory_space<vmem>>, vector<8x128xf32>
    %280 = vector.broadcast %278 : vector<8x1xf32> to vector<8x128xf32>
    %281 = arith.mulf %279, %280 : vector<8x128xf32>
    %282 = arith.addf %277, %281 : vector<8x128xf32>
    %283 = vector.extract_strided_slice %2 {offsets = [0, 54], sizes = [8, 1], strides = [1, 1]} : vector<8x55xf32> to vector<8x1xf32>
    %c0_88 = arith.constant 0 : index
    %c130_89 = arith.constant 130 : index
    %284 = vector.load %arg3[%c0_88, %c130_89] : memref<8x384xf32, #tpu.memory_space<vmem>>, vector<8x128xf32>
    %285 = vector.broadcast %283 : vector<8x1xf32> to vector<8x128xf32>
    %286 = arith.mulf %284, %285 : vector<8x128xf32>
    %287 = arith.addf %282, %286 : vector<8x128xf32>
    %288 = vector.extract_strided_slice %2 {offsets = [0, 4], sizes = [8, 1], strides = [1, 1]} : vector<8x55xf32> to vector<8x1xf32>
    %289 = vector.broadcast %288 : vector<8x1xf32> to vector<8x128xf32>
    %290 = arith.addf %287, %289 : vector<8x128xf32>
    %cst_90 = arith.constant 0.000000e+00 : f32
    %291 = vector.broadcast %cst_90 : f32 to vector<8x128xf32>
    %292 = arith.cmpf ogt, %290, %291 : vector<8x128xf32>
    %cst_91 = arith.constant 0.000000e+00 : f32
    %293 = vector.broadcast %cst_91 : f32 to vector<8x128xf32>
    %294 = arith.minimumf %290, %293 : vector<8x128xf32>
    %295 = math.exp %294 : vector<8x128xf32>
    %cst_92 = arith.constant 1.000000e+00 : f32
    %296 = vector.broadcast %cst_92 : f32 to vector<8x128xf32>
    %297 = arith.subf %295, %296 : vector<8x128xf32>
    %298 = arith.select %292, %290, %297 : vector<8x128xi1>, vector<8x128xf32>
    %299 = vector.extract_strided_slice %298 {offsets = [0, 0], sizes = [2, 128], strides = [1, 1]} : vector<8x128xf32> to vector<2x128xf32>
    %300 = vector.extract_strided_slice %298 {offsets = [0, 0], sizes = [2, 128], strides = [1, 1]} : vector<8x128xf32> to vector<2x128xf32>
    %301 = vector.extract_strided_slice %298 {offsets = [2, 0], sizes = [2, 128], strides = [1, 1]} : vector<8x128xf32> to vector<2x128xf32>
    %302 = arith.addf %299, %301 : vector<2x128xf32>
    %303 = arith.maximumf %300, %301 : vector<2x128xf32>
    %304 = vector.extract_strided_slice %298 {offsets = [4, 0], sizes = [2, 128], strides = [1, 1]} : vector<8x128xf32> to vector<2x128xf32>
    %305 = arith.addf %302, %304 : vector<2x128xf32>
    %306 = arith.maximumf %303, %304 : vector<2x128xf32>
    %307 = vector.extract_strided_slice %298 {offsets = [6, 0], sizes = [2, 128], strides = [1, 1]} : vector<8x128xf32> to vector<2x128xf32>
    %308 = arith.addf %305, %307 : vector<2x128xf32>
    %309 = arith.maximumf %306, %307 : vector<2x128xf32>
    %c0_93 = arith.constant 0 : index
    %c0_94 = arith.constant 0 : index
    %310 = vector.load %arg2[%c0_93, %c0_94] : memref<2x384xf32, #tpu.memory_space<vmem>>, vector<2x128xf32>
    tpu.vector_store %arg2[%c0_93, %c0_94], %308 {strides = array<i32>} : memref<2x384xf32, #tpu.memory_space<vmem>>, vector<2x128xf32>,
    %c0_95 = arith.constant 0 : index
    %c128_96 = arith.constant 128 : index
    %311 = vector.load %arg2[%c0_95, %c128_96] : memref<2x384xf32, #tpu.memory_space<vmem>>, vector<2x128xf32>
    tpu.vector_store %arg2[%c0_95, %c128_96], %309 {strides = array<i32>} : memref<2x384xf32, #tpu.memory_space<vmem>>, vector<2x128xf32>,
    %cst_97 = arith.constant 2.500000e-01 : f32
    %312 = vector.broadcast %cst_97 : f32 to vector<2x128xf32>
    %313 = arith.mulf %308, %312 : vector<2x128xf32>
    %c0_98 = arith.constant 0 : index
    %c256 = arith.constant 256 : index
    %314 = vector.load %arg2[%c0_98, %c256] : memref<2x384xf32, #tpu.memory_space<vmem>>, vector<2x128xf32>
    tpu.vector_store %arg2[%c0_98, %c256], %313 {strides = array<i32>} : memref<2x384xf32, #tpu.memory_space<vmem>>, vector<2x128xf32>,
    return
  }
}

</mosaic_0001>

<bundles_post_ra>
// kernel: forward.1
= control target key start
LH: loop header
LB: loop body
LE: loop exit
PB: predicated region body
PF: predicated region fallthrough
CT: control target
= control target key end

     0   :  { %v1228_v1 = vmov 6   ;;  %v1229_v2 = vmov 0   ;;  %s1640_s0 = inlined_call_operand.vmem [shape: f32[8,128], index: 0, kind: input, shape index: {}]   ;;  %s1641_s1 = inlined_call_operand.vmem [shape: f32[8,55], index: 1, kind: input, shape index: {}]   ;;  %s1642_s2 = inlined_call_operand.hbm [shape: f32[2,384], index: 2, kind: output, shape index: {}]  }
   0x1   :  { %v1335_v0 = vld [vmem:[%s1641_s1] sm:$0xff]  ;;  %1137 = vset.pattern.permute.xlu1 %v1228_v1  ;;  %1135 = vset.pattern.permute.xlu0 %v1229_v2 }
   0x2   :  { %7 = vsyncpa [#allocation4], 0  ;;  %40 = vperm.xlu1 %1137, %v1335_v0   ;;  %19 = vperm.xlu0 %1135, %v1335_v0   ;;  %v1230_v3 = vmov 7   ;;  %v1231_v4 = vmov 1   ;;  %v1232_v5 = vmov 8   ;;  %v1233_v6 = vmov 9  }
   0x3   :  { %v1234_v7 = vmov 10   ;;  %v1235_v8 = vmov 12   ;;  %v1236_v9 = vmov 11   ;;  %v1237_v10 = vmov 15   ;;  %v16_v36 = vld [vmem:[%s1640_s0] sm:$0xff]  ;;  %s1261_s13 = smov 127  }
   0x4   :  { %v1238_v11 = vmov 13   ;;  %v1239_v12 = vmov 18   ;;  %v1240_v13 = vmov 14   ;;  %v1241_v14 = vmov 21   ;;  %s1262_s14 = smov 126   ;;  %s1263_s0 = smov 125  }
   0x5   :  { %v1242_v15 = vmov 16   ;;  %v1243_v16 = vmov 24   ;;  %v1244_v17 = vmov 17   ;;  %v1245_v18 = vmov 27   ;;  %s1264_s15 = smov 124   ;;  %s1265_s16 = smov 123  }
   0x6   :  { %1138 = vset.pattern.permute.xlu1 %v1230_v3  ;;  %1136 = vset.pattern.permute.xlu0 %v1231_v4  ;;  %v1246_v19 = vmov 19   ;;  %v1247_v20 = vmov 30   ;;  %v1248_v21 = vmov 20   ;;  %v1249_v22 = vmov 33   ;;  %s1266_s17 = smov 122   ;;  %s1267_s18 = smov 121  }
   0x7   :  { %58 = vperm.xlu1 %1138, %v1335_v0   ;;  %24 = vperm.xlu0 %1136, %v1335_v0   ;;  %v1250_v23 = vmov 22   ;;  %v1251_v24 = vmov 23   ;;  %v1252_v25 = vmov 25   ;;  %v1253_v26 = vmov 26   ;;  %s1268_s19 = smov 120   ;;  %s1269_s20 = smov 119  }
   0x8   :  { %v1254_v27 = vmov 28   ;;  %v1255_v28 = vmov 29   ;;  %v1256_v29 = vmov 31   ;;  %v1257_v30 = vmov 32   ;;  %s1270_s21 = smov 118   ;;  %s1271_s22 = smov 117  }
   0x9   :  { %v1258_v31 = vmov 34   ;;  %v1259_v32 = vmov 5   ;;  %v1260_v33 = vmov 2   ;;  %s1272_s23 = smov 116   ;;  %s1273_s24 = smov 115   ;;  %vm51_vm0 = vcmask 1039360  }
   0xa   :  { %s1274_s25 = smov 114   ;;  %s1275_s26 = smov 113   ;;  %vm69_vm1 = vcmask 1031168   ;;  %vm87_vm2 = vcmask 1022976   ;;  %vm105_vm3 = vcmask 1014784   ;;  %vm123_vm4 = vcmask 1006592  }
   0xb   :  { %1139 = vset.pattern.permute.xlu1 %v1232_v5  ;;  %1140 = vset.pattern.permute.xlu0 %v1233_v6  ;;  %s1276_s27 = smov 112   ;;  %s1277_s28 = smov 111   ;;  %vm141_vm5 = vcmask 998400   ;;  %vm159_vm6 = vcmask 990208   ;;  %vm177_vm7 = vcmask 982016   ;;  %vm195_vm8 = vcmask 973824  }
   0xc   :  { %76 = vperm.xlu1 %1139, %v1335_v0   ;;  %94 = vperm.xlu0 %1140, %v1335_v0   ;;  %s1278_s29 = smov 110   ;;  %s1279_s30 = smov 109   ;;  %vm213_vm9 = vcmask 965632   ;;  %vm1645_vm10 = vcmask 957440   ;;  %vm1644_vm11 = vcmask 949248   ;;  %vm1643_vm12 = vcmask 941056  }
   0xd   :  { %s1280_s3 = smov 108   ;;  %s1281_s4 = smov 107   ;;  %vm298_vm13 = vcmask 924672   ;;  %vm316_vm14 = vcmask 916480   ;;  %vm334_vm15 = vcmask 908288  }
   0xe   :  { %s1282_s5 = smov 106   ;;  %s1283_s6 = smov 105  }
   0xf   :  { %s1284_s7 = smov 104   ;;  %s1285_s8 = smov 103  }
  0x10   :  { %1141 = vset.pattern.permute.xlu1 %v1234_v7  ;;  %1143 = vset.pattern.permute.xlu0 %v1235_v8  ;;  %s1286_s9 = smov 102   ;;  %s1288_s10 = smov 101  }
  0x11   :  { %112 = vperm.xlu1 %1141, %v1335_v0   ;;  %148 = vperm.xlu0 %1143, %v1335_v0   ;;  %s1289_s11 = smov 100   ;;  %s1290_s12 = smov 99  }
  0x15   :  { %1142 = vset.pattern.permute.xlu1 %v1236_v9  ;;  %1146 = vset.pattern.permute.xlu0 %v1237_v10 }
  0x16   :  { %130 = vperm.xlu1 %1142, %v1335_v0   ;;  %202 = vperm.xlu0 %1146, %v1335_v0  }
  0x1a   :  { %1144 = vset.pattern.permute.xlu1 %v1238_v11  ;;  %1149 = vset.pattern.permute.xlu0 %v1239_v12 }
  0x1b   :  { %166 = vperm.xlu1 %1144, %v1335_v0   ;;  %256 = vperm.xlu0 %1149, %v1335_v0  }
  0x1f   :  { %1145 = vset.pattern.permute.xlu1 %v1240_v13  ;;  %1152 = vset.pattern.permute.xlu0 %v1241_v14 }
  0x20   :  { %184 = vperm.xlu1 %1145, %v1335_v0   ;;  %305 = vperm.xlu0 %1152, %v1335_v0  }
  0x24   :  { %1147 = vset.pattern.permute.xlu1 %v1242_v15  ;;  %1155 = vset.pattern.permute.xlu0 %v1243_v16 }
  0x25   :  { %220 = vperm.xlu1 %1147, %v1335_v0   ;;  %359 = vperm.xlu0 %1155, %v1335_v0  }
  0x29   :  { %1148 = vset.pattern.permute.xlu1 %v1244_v17  ;;  %1158 = vset.pattern.permute.xlu0 %v1245_v18 }
  0x2a   :  { %238 = vperm.xlu1 %1148, %v1335_v0   ;;  %413 = vperm.xlu0 %1158, %v1335_v0  }
  0x2e   :  { %1150 = vset.pattern.permute.xlu1 %v1246_v19  ;;  %1161 = vset.pattern.permute.xlu0 %v1247_v20 }
  0x2f   :  { %274 = vperm.xlu1 %1150, %v1335_v0   ;;  %467 = vperm.xlu0 %1161, %v1335_v0  }
  0x33   :  { %1151 = vset.pattern.permute.xlu1 %v1248_v21  ;;  %1164 = vset.pattern.permute.xlu0 %v1249_v22 }
  0x34   :  { %287 = vperm.xlu1 %1151, %v1335_v0   ;;  %521 = vperm.xlu0 %1164, %v1335_v0  }
  0x38   :  { %1153 = vset.pattern.permute.xlu1 %v1250_v23 }
  0x39   :  { %323 = vperm.xlu1 %1153, %v1335_v0  }
  0x3d   :  { %1154 = vset.pattern.permute.xlu1 %v1251_v24 }
  0x3e   :  { %341 = vperm.xlu1 %1154, %v1335_v0  }
  0x42   :  { %1156 = vset.pattern.permute.xlu1 %v1252_v25 }
  0x43   :  { %377 = vperm.xlu1 %1156, %v1335_v0  }
  0x47   :  { %1157 = vset.pattern.permute.xlu1 %v1253_v26 }
  0x48   :  { %395 = vperm.xlu1 %1157, %v1335_v0  }
  0x4c   :  { %1159 = vset.pattern.permute.xlu1 %v1254_v27 }
  0x4d   :  { %431 = vperm.xlu1 %1159, %v1335_v0  }
  0x51   :  { %1160 = vset.pattern.permute.xlu1 %v1255_v28 }
  0x52   :  { %449 = vperm.xlu1 %1160, %v1335_v0  }
  0x56   :  { %1162 = vset.pattern.permute.xlu1 %v1256_v29 }
  0x57   :  { %485 = vperm.xlu1 %1162, %v1335_v0  }
  0x5b   :  { %1163 = vset.pattern.permute.xlu1 %v1257_v30 }
  0x5c   :  { %503 = vperm.xlu1 %1163, %v1335_v0  }
  0x60   :  { %1165 = vset.pattern.permute.xlu1 %v1258_v31 }
  0x61   :  { %539 = vperm.xlu1 %1165, %v1335_v0  }
  0x65   :  { %1166 = vset.pattern.permute.xlu1 %v1259_v32 }
  0x66   :  { %32 = vperm.xlu1 %1166, %v1335_v0  }
  0x6a   :  { %1167 = vset.pattern.permute.xlu1 %v1260_v33 }
  0x81   :  { %v20_v34 = vpop.permute.xlu0 %19  ;;  %v41_v35 = vpop.permute.xlu1 %40 }
  0x82   :  { %v43_v37 = vmul.f32 0.0, %v41_v35  ;;  %v22_v38 = vmul.f32 %v20_v34, %v16_v36 }
  0x84   :  { %47 = vrot.lane.b32.xlu0 %v43_v37, %s1261_s13 }
  0x86   :  { %v25_v39 = vpop.permute.xlu0 %24  ;;  %v59_v40 = vpop.permute.xlu1 %58 }
  0x87   :  { %v1373_v41 = vadd.f32 %v25_v39, %v22_v38  ;;  %v61_v42 = vmul.f32 0.0, %v59_v40 }
  0x89   :  { %65 = vrot.lane.b32.xlu0 %v61_v42, %s1262_s14  ;;  %v44_v43 = vmul.f32 %v41_v35, %v1373_v41  ;;  %v62_v46 = vmul.f32 %v59_v40, %v1373_v41 }
  0x8b   :  { %v77_v44 = vpop.permute.xlu1 %76  ;;  %49 = vrot.lane.b32.xlu1 %v44_v43, %s1261_s13  ;;  %v95_v47 = vpop.permute.xlu0 %94 }
  0x8c   :  { %v79_v45 = vmul.f32 0.0, %v77_v44  ;;  %v97_v48 = vmul.f32 0.0, %v95_v47  ;;  %v80_v50 = vmul.f32 %v77_v44, %v1373_v41  ;;  %v98_v52 = vmul.f32 %v95_v47, %v1373_v41 }
  0x8e   :  { %83 = vrot.lane.b32.xlu0 %v79_v45, %s1263_s0 }
  0x8f   :  { %67 = vrot.lane.b32.xlu1 %v62_v46, %s1262_s14 }
  0x90   :  { %v113_v49 = vpop.permute.xlu1 %112  ;;  %v149_v56 = vpop.permute.xlu0 %148 }
  0x91   :  { %v115_v51 = vmul.f32 0.0, %v113_v49  ;;  %v116_v55 = vmul.f32 %v113_v49, %v1373_v41  ;;  %v151_v57 = vmul.f32 0.0, %v149_v56  ;;  %v152_v61 = vmul.f32 %v149_v56, %v1373_v41 }
  0x92   :  { %101 = vrot.lane.b32.xlu0 %v97_v48, %s1264_s15  ;;  %v1287_v56 = vmov 36  }
  0x93   :  { %85 = vrot.lane.b32.xlu1 %v80_v50, %s1263_s0  ;;  %1168 = vset.pattern.permute.xlu0 %v1287_v56 }
  0x95   :  { %v131_v53 = vpop.permute.xlu1 %130  ;;  %v203_v1 = vpop.permute.xlu0 %202 }
  0x96   :  { %v133_v54 = vmul.f32 0.0, %v131_v53  ;;  %119 = vrot.lane.b32.xlu0 %v115_v51, %s1265_s16  ;;  %v134_v59 = vmul.f32 %v131_v53, %v1373_v41  ;;  %v205_v3 = vmul.f32 0.0, %v203_v1  ;;  %v206_v7 = vmul.f32 %v203_v1, %v1373_v41 }
  0x97   :  { %103 = vrot.lane.b32.xlu1 %v98_v52, %s1264_s15 }
  0x9a   :  { %137 = vrot.lane.b32.xlu0 %v133_v54, %s1266_s17  ;;  %v167_v58 = vpop.permute.xlu1 %166  ;;  %v257_v10 = vpop.permute.xlu0 %256 }
  0x9b   :  { %121 = vrot.lane.b32.xlu1 %v116_v55, %s1265_s16  ;;  %v169_v60 = vmul.f32 0.0, %v167_v58  ;;  %v170_v2 = vmul.f32 %v167_v58, %v1373_v41  ;;  %v259_v12 = vmul.f32 0.0, %v257_v10  ;;  %v260_v16 = vmul.f32 %v257_v10, %v1373_v41 }
  0x9e   :  { %155 = vrot.lane.b32.xlu0 %v151_v57, %s1267_s18 }
  0x9f   :  { %139 = vrot.lane.b32.xlu1 %v134_v59, %s1266_s17  ;;  %v185_v62 = vpop.permute.xlu1 %184  ;;  %v306_v19 = vpop.permute.xlu0 %305 }
  0xa0   :  { %v187_v63 = vmul.f32 0.0, %v185_v62  ;;  %v188_v5 = vmul.f32 %v185_v62, %v1373_v41  ;;  %v309_v21 = vmul.f32 0.0, %v306_v19  ;;  %v308_v23 = vmul.f32 %v306_v19, %v1373_v41 }
  0xa2   :  { %173 = vrot.lane.b32.xlu0 %v169_v60, %s1268_s19 }
  0xa3   :  { %157 = vrot.lane.b32.xlu1 %v152_v61, %s1267_s18 }
  0xa4   :  { %v221_v4 = vpop.permute.xlu1 %220  ;;  %v360_v28 = vpop.permute.xlu0 %359 }
  0xa5   :  { %v223_v6 = vmul.f32 0.0, %v221_v4  ;;  %v224_v11 = vmul.f32 %v221_v4, %v1373_v41  ;;  %v363_v30 = vmul.f32 0.0, %v360_v28  ;;  %v362_v32 = vmul.f32 %v360_v28, %v1373_v41 }
  0xa6   :  { %191 = vrot.lane.b32.xlu0 %v187_v63, %s1269_s20 }
  0xa7   :  { %175 = vrot.lane.b32.xlu1 %v170_v2, %s1268_s19  ;;  %v1291_v2 = vmov 37  }
  0xa9   :  { %v239_v8 = vpop.permute.xlu1 %238  ;;  %v414_v37 = vpop.permute.xlu0 %413 }
  0xaa   :  { %209 = vrot.lane.b32.xlu0 %v205_v3, %s1270_s21  ;;  %v241_v9 = vmul.f32 0.0, %v239_v8  ;;  %v242_v14 = vmul.f32 %v239_v8, %v1373_v41  ;;  %v417_v39 = vmul.f32 0.0, %v414_v37  ;;  %v416_v42 = vmul.f32 %v414_v37, %v1373_v41 }
  0xab   :  { %193 = vrot.lane.b32.xlu1 %v188_v5, %s1269_s20 }
  0xae   :  { %227 = vrot.lane.b32.xlu0 %v223_v6, %s1271_s22  ;;  %v275_v13 = vpop.permute.xlu1 %274  ;;  %v468_v47 = vpop.permute.xlu0 %467  ;;  %v1292_v6 = vmov 39  }
  0xaf   :  { %211 = vrot.lane.b32.xlu1 %v206_v7, %s1270_s21  ;;  %v277_v15 = vmul.f32 %v275_v13, %v1373_v41  ;;  %v471_v49 = vmul.f32 0.0, %v468_v47  ;;  %v470_v51 = vmul.f32 %v468_v47, %v1373_v41  ;;  %v1294_v13 = vmov 40  }
  0xb2   :  { %245 = vrot.lane.b32.xlu0 %v241_v9, %s1272_s23  ;;  %v1293_v9 = vmov 38  }
  0xb3   :  { %229 = vrot.lane.b32.xlu1 %v224_v11, %s1271_s22  ;;  %v288_v17 = vpop.permute.xlu1 %287  ;;  %v522_v57 = vpop.permute.xlu0 %521 }
  0xb4   :  { %v291_v18 = vmul.f32 0.0, %v288_v17  ;;  %v290_v20 = vmul.f32 %v288_v17, %v1373_v41  ;;  %v524_v59 = vmul.f32 %v522_v57, %v1373_v41  ;;  %v525_v61 = vmul.f32 0.0, %v522_v57 }
  0xb6   :  { %263 = vrot.lane.b32.xlu0 %v259_v12, %s1273_s24 }
  0xb7   :  { %247 = vrot.lane.b32.xlu1 %v242_v14, %s1272_s23  ;;  %v1295_v14 = vmov 42  }
  0xb8   :  { %v324_v22 = vpop.permute.xlu1 %323 }
  0xb9   :  { %v327_v24 = vmul.f32 0.0, %v324_v22  ;;  %v326_v25 = vmul.f32 %v324_v22, %v1373_v41 }
  0xba   :  { %279 = vrot.lane.b32.xlu0 %v277_v15, %s1274_s25 }
  0xbb   :  { %265 = vrot.lane.b32.xlu1 %v260_v16, %s1273_s24 }
  0xbd   :  { %v342_v26 = vpop.permute.xlu1 %341 }
  0xbe   :  { %296 = vrot.lane.b32.xlu0 %v291_v18, %s1275_s26  ;;  %v345_v27 = vmul.f32 0.0, %v342_v26  ;;  %v344_v29 = vmul.f32 %v342_v26, %v1373_v41  ;;  %v1296_v18 = vmov 41  }
  0xbf   :  { %294 = vrot.lane.b32.xlu1 %v290_v20, %s1275_s26  ;;  %s1298_s26 = smov 14  }
  0xc2   :  { %314 = vrot.lane.b32.xlu0 %v309_v21, %s1276_s27  ;;  %v378_v31 = vpop.permute.xlu1 %377 }
  0xc3   :  { %312 = vrot.lane.b32.xlu1 %v308_v23, %s1276_s27  ;;  %v381_v33 = vmul.f32 0.0, %v378_v31  ;;  %v380_v34 = vmul.f32 %v378_v31, %v1373_v41  ;;  %v1297_v23 = vmov 43  }
  0xc6   :  { %332 = vrot.lane.b32.xlu0 %v327_v24, %s1277_s28 }
  0xc7   :  { %330 = vrot.lane.b32.xlu1 %v326_v25, %s1277_s28  ;;  %v396_v35 = vpop.permute.xlu1 %395 }
  0xc8   :  { %v399_v36 = vmul.f32 0.0, %v396_v35  ;;  %v398_v38 = vmul.f32 %v396_v35, %v1373_v41 }
  0xca   :  { %350 = vrot.lane.b32.xlu0 %v345_v27, %s1278_s29 }
  0xcb   :  { %348 = vrot.lane.b32.xlu1 %v344_v29, %s1278_s29 }
  0xcc   :  { %v432_v40 = vpop.permute.xlu1 %431 }
  0xcd   :  { %v435_v43 = vmul.f32 0.0, %v432_v40  ;;  %v434_v44 = vmul.f32 %v432_v40, %v1373_v41 }
  0xce   :  { %368 = vrot.lane.b32.xlu0 %v363_v30, %s1279_s30 }
  0xcf   :  { %366 = vrot.lane.b32.xlu1 %v362_v32, %s1279_s30 }
  0xd1   :  { %v450_v45 = vpop.permute.xlu1 %449 }
  0xd2   :  { %386 = vrot.lane.b32.xlu0 %v381_v33, %s1280_s3  ;;  %v453_v46 = vmul.f32 0.0, %v450_v45  ;;  %v452_v48 = vmul.f32 %v450_v45, %v1373_v41 }
  0xd3   :  { %384 = vrot.lane.b32.xlu1 %v380_v34, %s1280_s3 }
  0xd6   :  { %404 = vrot.lane.b32.xlu0 %v399_v36, %s1281_s4  ;;  %v486_v50 = vpop.permute.xlu1 %485 }
  0xd7   :  { %402 = vrot.lane.b32.xlu1 %v398_v38, %s1281_s4  ;;  %v489_v52 = vmul.f32 0.0, %v486_v50  ;;  %v488_v53 = vmul.f32 %v486_v50, %v1373_v41 }
  0xda   :  { %422 = vrot.lane.b32.xlu0 %v417_v39, %s1282_s5 }
  0xdb   :  { %420 = vrot.lane.b32.xlu1 %v416_v42, %s1282_s5  ;;  %v504_v54 = vpop.permute.xlu1 %503 }
  0xdc   :  { %v507_v55 = vmul.f32 0.0, %v504_v54  ;;  %v506_v58 = vmul.f32 %v504_v54, %v1373_v41 }
  0xde   :  { %440 = vrot.lane.b32.xlu0 %v435_v43, %s1283_s6 }
  0xdf   :  { %438 = vrot.lane.b32.xlu1 %v434_v44, %s1283_s6 }
  0xe0   :  { %v540_v60 = vpop.permute.xlu1 %539 }
  0xe1   :  { %v542_v62 = vmul.f32 %v540_v60, %v1373_v41  ;;  %v543_v1 = vmul.f32 0.0, %v540_v60 }
  0xe2   :  { %458 = vrot.lane.b32.xlu0 %v453_v46, %s1284_s7 }
  0xe3   :  { %456 = vrot.lane.b32.xlu1 %v452_v48, %s1284_s7 }
  0xe5   :  { %v1431_v3 = vpop.permute.xlu1 %32 }
  0xe6   :  { %476 = vrot.lane.b32.xlu0 %v471_v49, %s1285_s8  ;;  %v35_v35 = vmul.f32 0.0, %v1431_v3 }
  0xe7   :  { %474 = vrot.lane.b32.xlu1 %v470_v51, %s1285_s8 }
  0xea   :  { %494 = vrot.lane.b32.xlu0 %v489_v52, %s1286_s9 }
  0xeb   :  { %492 = vrot.lane.b32.xlu1 %v488_v53, %s1286_s9 }
  0xee   :  { %512 = vrot.lane.b32.xlu0 %v507_v55, %s1288_s10 }
  0xef   :  { %510 = vrot.lane.b32.xlu1 %v506_v58, %s1288_s10 }
  0xf2   :  { %528 = vrot.lane.b32.xlu0 %v524_v59, %s1289_s11 }
  0xf3   :  { %557 = vperm.xlu1 %1167, %v1335_v0  }
  0xf6   :  { %546 = vrot.lane.b32.xlu0 %v542_v62, %s1290_s12  ;;  %v48_v63 = vpop.permute.xlu0 %47 }
  0xf7   :  { %530 = vrot.lane.b32.xlu1 %v525_v61, %s1289_s11  ;;  %v36_v61 = vmul.f32 %v1431_v3, %v1373_v41 }
  0xf8   :  { %1169 = vset.pattern.permute.xlu1 %v1291_v2 }
  0xfa   :  { %595 = vperm.xlu0 %1168, %v1335_v0  }
  0xfb   :  { %v66_v4 = vpop.permute.xlu0 %65  ;;  %548 = vrot.lane.b32.xlu1 %v543_v1, %s1290_s12 }
  0xfd   :  { %v1434_v5 = vpop.permute.xlu1 %49 }
  0xfe   :  { %1171 = vset.pattern.permute.xlu0 %v1292_v6  ;;  %v52_v37 = vsel %vm51_vm0, %v48_v63, %v1434_v5  ;;  %v56_v1 = vadd.f32 %v1434_v5, %v36_v61 }
  0xff   :  { %612 = vperm.xlu1 %1169, %v1335_v0   ;;  %646 = vperm.xlu0 %1171, %v1335_v0   ;;  %v55_v40 = vadd.f32 %v52_v37, %v35_v35 }
 0x100   :  { %v84_v7 = vpop.permute.xlu0 %83 }
 0x101   :  { %v1438_v8 = vpop.permute.xlu1 %67 }
 0x102   :  { %v70_v38 = vsel %vm69_vm1, %v66_v4, %v1438_v8 }
 0x103   :  { %1170 = vset.pattern.permute.xlu1 %v1293_v9  ;;  %1174 = vset.pattern.permute.xlu0 %v1295_v14  ;;  %v73_v44 = vadd.f32 %v70_v38, %v55_v40  ;;  %v74_v9 = vadd.f32 %v1438_v8, %v56_v1 }
 0x104   :  { %v102_v10 = vpop.permute.xlu0 %101  ;;  %629 = vperm.xlu1 %1170, %v1335_v0  }
 0x105   :  { %v1441_v11 = vpop.permute.xlu1 %85 }
 0x106   :  { %v88_v43 = vsel %vm87_vm2, %v84_v7, %v1441_v11 }
 0x107   :  { %v91_v47 = vadd.f32 %v88_v43, %v73_v44 }
 0x108   :  { %v120_v12 = vpop.permute.xlu0 %119  ;;  %1172 = vset.pattern.permute.xlu1 %v1294_v13 }
 0x109   :  { %v1443_v15 = vpop.permute.xlu1 %103  ;;  %663 = vperm.xlu1 %1172, %v1335_v0  }
 0x10a   :  { %v106_v45 = vsel %vm105_vm3, %v102_v10, %v1443_v15  ;;  %v92_v10 = vadd.f32 %v1441_v11, %v74_v9 }
 0x10b   :  { %v109_v50 = vadd.f32 %v106_v45, %v91_v47 }
 0x10c   :  { %v138_v16 = vpop.permute.xlu0 %137 }
 0x10d   :  { %v1446_v17 = vpop.permute.xlu1 %121  ;;  %1173 = vset.pattern.permute.xlu1 %v1296_v18 }
 0x10e   :  { %680 = vperm.xlu1 %1173, %v1335_v0   ;;  %v124_v49 = vsel %vm123_vm4, %v120_v12, %v1446_v17 }
 0x10f   :  { %v127_v53 = vadd.f32 %v124_v49, %v109_v50 }
 0x110   :  { %v156_v19 = vpop.permute.xlu0 %155 }
 0x111   :  { %v1449_v20 = vpop.permute.xlu1 %139 }
 0x112   :  { %1175 = vset.pattern.permute.xlu1 %v1297_v23  ;;  %v142_v51 = vsel %vm141_vm5, %v138_v16, %v1449_v20  ;;  %v110_v16 = vadd.f32 %v1443_v15, %v92_v10 }
 0x113   :  { %v145_v56 = vadd.f32 %v142_v51, %v127_v53 }
 0x114   :  { %v174_v21 = vpop.permute.xlu0 %173  ;;  %v128_v8 = vadd.f32 %v1446_v17, %v110_v16 }
 0x115   :  { %v1451_v22 = vpop.permute.xlu1 %157 }
 0x116   :  { %v160_v55 = vsel %vm159_vm6, %v156_v19, %v1451_v22  ;;  %vm352_vm6 = vcmask 900096  }
 0x117   :  { %v163_v59 = vadd.f32 %v160_v55, %v145_v56 }
 0x118   :  { %v192_v24 = vpop.permute.xlu0 %191 }
 0x119   :  { %v1453_v25 = vpop.permute.xlu1 %175 }
 0x11a   :  { %v178_v57 = vsel %vm177_vm7, %v174_v21, %v1453_v25 }
 0x11b   :  { %v181_v63 = vadd.f32 %v178_v57, %v163_v59 }
 0x11c   :  { %v210_v26 = vpop.permute.xlu0 %209 }
 0x11d   :  { %v1455_v27 = vpop.permute.xlu1 %193 }
 0x11e   :  { %v196_v62 = vsel %vm195_vm8, %v192_v24, %v1455_v27 }
 0x11f   :  { %v199_v6 = vadd.f32 %v196_v62, %v181_v63 }
 0x120   :  { %v228_v28 = vpop.permute.xlu0 %227 }
 0x121   :  { %v1457_v29 = vpop.permute.xlu1 %211 }
 0x122   :  { %v214_v2 = vsel %vm213_vm9, %v210_v26, %v1457_v29  ;;  %v146_v26 = vadd.f32 %v1449_v20, %v128_v8 }
 0x123   :  { %v217_v3 = vadd.f32 %v214_v2, %v199_v6 }
 0x124   :  { %v246_v30 = vpop.permute.xlu0 %245  ;;  %v164_v11 = vadd.f32 %v1451_v22, %v146_v26 }
 0x125   :  { %v1459_v31 = vpop.permute.xlu1 %229 }
 0x126   :  { %v232_v41 = vsel %vm1645_vm10, %v228_v28, %v1459_v31  ;;  %v182_v37 = vadd.f32 %v1453_v25, %v164_v11  ;;  %vm514_vm10 = vcmask 826368  }
 0x127   :  { %v235_v13 = vadd.f32 %v232_v41, %v217_v3 }
 0x128   :  { %v264_v32 = vpop.permute.xlu0 %263  ;;  %v200_v15 = vadd.f32 %v1455_v27, %v182_v37 }
 0x129   :  { %v1461_v33 = vpop.permute.xlu1 %247 }
 0x12a   :  { %v250_v5 = vsel %vm1644_vm11, %v246_v30, %v1461_v33  ;;  %v218_v17 = vadd.f32 %v1457_v29, %v200_v15  ;;  %vm442_vm11 = vcmask 859136  }
 0x12b   :  { %v253_v19 = vadd.f32 %v250_v5, %v235_v13 }
 0x12c   :  { %v1463_v34 = vpop.permute.xlu0 %279  ;;  %v236_v43 = vadd.f32 %v1459_v31, %v218_v17 }
 0x12d   :  { %v1466_v36 = vpop.permute.xlu1 %265 }
 0x12e   :  { %v268_v18 = vsel %vm1643_vm12, %v264_v32, %v1466_v36  ;;  %v254_v22 = vadd.f32 %v1461_v33, %v236_v43  ;;  %vm370_vm12 = vcmask 891904  }
 0x12f   :  { %v271_v23 = vadd.f32 %v268_v18, %v253_v19 }
 0x130   :  { %v1472_v39 = vpop.permute.xlu0 %296  ;;  %v272_v25 = vadd.f32 %v1466_v36, %v254_v22 }
 0x131   :  { %v1474_v42 = vpop.permute.xlu1 %294  ;;  %v282_v30 = vadd.f32 %v1463_v34, %v271_v23 }
 0x132   :  { %v283_v51 = vadd.f32 %v1463_v34, %v272_v25  ;;  %v299_v53 = vsel %vm298_vm13, %v1474_v42, %v1472_v39  ;;  %vm388_vm13 = vcmask 883712  }
 0x133   :  { %v302_v32 = vadd.f32 %v1474_v42, %v282_v30 }
 0x134   :  { %v1480_v46 = vpop.permute.xlu0 %314  ;;  %v303_v36 = vadd.f32 %v299_v53, %v283_v51 }
 0x135   :  { %v1482_v48 = vpop.permute.xlu1 %312 }
 0x136   :  { %v320_v20 = vadd.f32 %v1482_v48, %v302_v32  ;;  %v317_v33 = vsel %vm316_vm14, %v1482_v48, %v1480_v46  ;;  %vm406_vm14 = vcmask 875520  }
 0x137   :  { %v321_v61 = vadd.f32 %v317_v33, %v303_v36 }
 0x138   :  { %v1488_v52 = vpop.permute.xlu0 %332 }
 0x139   :  { %v1490_v54 = vpop.permute.xlu1 %330 }
 0x13a   :  { %v338_v47 = vadd.f32 %v1490_v54, %v320_v20  ;;  %v335_v57 = vsel %vm334_vm15, %v1490_v54, %v1488_v52  ;;  %vm424_vm15 = vcmask 867328  }
 0x13b   :  { %v339_v42 = vadd.f32 %v335_v57, %v321_v61  ;;  %v1551_v61 = vld [vmem:[%s1641_s1] sm:$0xff]  ;;  %s1312_s1 = smov 7  }
 0x13c   :  { %v1495_v58 = vpop.permute.xlu0 %350 }
 0x13d   :  { %v1497_v60 = vpop.permute.xlu1 %348 }
 0x13e   :  { %v356_v27 = vadd.f32 %v1497_v60, %v338_v47  ;;  %v353_v63 = vsel %vm352_vm6, %v1497_v60, %v1495_v58  ;;  %vm460_vm6 = vcmask 850944  }
 0x13f   :  { %v357_v48 = vadd.f32 %v353_v63, %v339_v42 }
 0x140   :  { %v1506_v4 = vpop.permute.xlu0 %368 }
 0x141   :  { %v367_v7 = vpop.permute.xlu1 %366 }
 0x142   :  { %v374_v50 = vadd.f32 %v367_v7, %v356_v27  ;;  %v371_v1 = vsel %vm370_vm12, %v367_v7, %v1506_v4  ;;  %vm478_vm12 = vcmask 842752   ;;  %v1299_v27 = vmov 45  }
 0x143   :  { %v375_v9 = vadd.f32 %v371_v1, %v357_v48  ;;  %v1304_v1 = vmov 49   ;;  %v1305_v48 = vmov 35  }
 0x144   :  { %v387_v12 = vpop.permute.xlu0 %386 }
 0x145   :  { %v385_v14 = vpop.permute.xlu1 %384 }
 0x146   :  { %v392_v55 = vadd.f32 %v385_v14, %v374_v50  ;;  %v389_v2 = vsel %vm388_vm13, %v385_v14, %v387_v12  ;;  %vm496_vm13 = vcmask 834560  }
 0x147   :  { %v393_v10 = vadd.f32 %v389_v2, %v375_v9  ;;  %v1306_v2 = vmov 3  }
 0x148   :  { %v405_v21 = vpop.permute.xlu0 %404 }
 0x149   :  { %v403_v24 = vpop.permute.xlu1 %402 }
 0x14a   :  { %v410_v56 = vadd.f32 %v403_v24, %v392_v55  ;;  %v407_v41 = vsel %vm406_vm14, %v403_v24, %v405_v21  ;;  %vm532_vm14 = vcmask 818176  }
 0x14b   :  { %v411_v60 = vadd.f32 %v407_v41, %v393_v10 }
 0x14c   :  { %v423_v28 = vpop.permute.xlu0 %422 }
 0x14d   :  { %v421_v35 = vpop.permute.xlu1 %420 }
 0x14e   :  { %v428_v59 = vadd.f32 %v421_v35, %v410_v56  ;;  %v425_v5 = vsel %vm424_vm15, %v421_v35, %v423_v28  ;;  %v1301_v56 = vmov 44  }
 0x14f   :  { %v429_v16 = vadd.f32 %v425_v5, %v411_v60 }
 0x150   :  { %v441_v38 = vpop.permute.xlu0 %440 }
 0x151   :  { %v439_v40 = vpop.permute.xlu1 %438 }
 0x152   :  { %v446_v39 = vadd.f32 %v439_v40, %v428_v59  ;;  %v443_v13 = vsel %vm442_vm11, %v439_v40, %v441_v38  ;;  %vm550_vm11 = vcmask 809984   ;;  %v1302_v59 = vmov 46  }
 0x153   :  { %v447_v12 = vadd.f32 %v443_v13, %v429_v16 }
 0x154   :  { %v459_v44 = vpop.permute.xlu0 %458 }
 0x155   :  { %v457_v45 = vpop.permute.xlu1 %456 }
 0x156   :  { %v464_v46 = vadd.f32 %v457_v45, %v446_v39  ;;  %v461_v7 = vsel %vm460_vm6, %v457_v45, %v459_v44  ;;  %v1303_v39 = vmov 47   ;;  %vm580_vm6 = vcmask 113664  }
 0x157   :  { %v465_v8 = vadd.f32 %v461_v7, %v447_v12 }
 0x158   :  { %v477_v49 = vpop.permute.xlu0 %476 }
 0x159   :  { %v475_v29 = vpop.permute.xlu1 %474 }
 0x15a   :  { %v482_v6 = vadd.f32 %v475_v29, %v464_v46  ;;  %v479_v14 = vsel %vm478_vm12, %v475_v29, %v477_v49  ;;  %vm853_vm12 = vcmask 56320  }
 0x15b   :  { %v483_v26 = vadd.f32 %v479_v14, %v465_v8 }
 0x15c   :  { %v495_v31 = vpop.permute.xlu0 %494 }
 0x15d   :  { %v493_v34 = vpop.permute.xlu1 %492 }
 0x15e   :  { %v500_v3 = vadd.f32 %v493_v34, %v482_v6  ;;  %v497_v23 = vsel %vm496_vm13, %v493_v34, %v495_v31  ;;  %v1300_v31 = vmov 48  }
 0x15f   :  { %v501_v30 = vadd.f32 %v497_v23, %v483_v26 }
 0x160   :  { %v513_v62 = vpop.permute.xlu0 %512 }
 0x161   :  { %v511_v52 = vpop.permute.xlu1 %510 }
 0x162   :  { %v518_v58 = vadd.f32 %v511_v52, %v500_v3  ;;  %v515_v11 = vsel %vm514_vm10, %v511_v52, %v513_v62 }
 0x163   :  { %v519_v38 = vadd.f32 %v515_v11, %v501_v30 }
 0x164   :  { %v529_v54 = vpop.permute.xlu0 %528 }
 0x165   :  { %v536_v18 = vadd.f32 %v529_v54, %v518_v58 }
 0x168   :  { %v547_v4 = vpop.permute.xlu0 %546 }
 0x169   :  { %v554_v19 = vadd.f32 %v547_v4, %v536_v18 }
 0x172   :  { %v558_v21 = vpop.permute.xlu1 %557 }
 0x173   :  { %v560_v24 = vadd.f32 %v558_v21, %v554_v19 }
 0x175   :  { %v564_v28 = vmin.f32 %v560_v24, 0.0  ;;  %vm562_vm15 = vcmp.gt.f32.partialorder %v560_v24, 0.0 }
 0x176   :  { %v531_v35 = vpop.permute.xlu1 %530 }
 0x177   :  { %v566_v37 = vmul.f32 1.442695, %v564_v28  ;;  %v533_v15 = vsel %vm532_vm14, %v529_v54, %v531_v35 }
 0x178   :  { %v537_v32 = vadd.f32 %v533_v15, %v519_v38  ;;  %v1307_v38 = vmov 51  }
 0x179   :  { %1191 = vpow2.f32 %v566_v37  ;;  %v596_v29 = vpop.permute.xlu0 %595 }
 0x17a   :  { %v549_v40 = vpop.permute.xlu1 %548  ;;  %v598_v55 = vmul.f32 0.0, %v596_v29 }
 0x17b   :  { %v551_v17 = vsel %vm550_vm11, %v547_v4, %v549_v40 }
 0x17c   :  { %v555_v43 = vadd.f32 %v551_v17, %v537_v32 }
 0x17e   :  { %v561_v44 = vadd.f32 %v558_v21, %v555_v43  ;;  %v613_v53 = vpop.permute.xlu1 %612  ;;  %v647_v34 = vpop.permute.xlu0 %646  ;;  %v1308_v43 = vmov 52  }
 0x17f   :  { %v615_v33 = vmul.f32 0.0, %v613_v53  ;;  %v649_v63 = vmul.f32 0.0, %v647_v34 }
 0x180   :  { %v565_v20 = vmin.f32 %v561_v44, 0.0  ;;  %vm563_vm10 = vcmp.gt.f32.partialorder %v561_v44, 0.0 }
 0x182   :  { %v568_v22 = vmul.f32 1.442695, %v565_v20  ;;  %v1310_v20 = vmov 54  }
 0x183   :  { %v1192_v45 = vpop.eup %1191  ;;  %v630_v36 = vpop.permute.xlu1 %629 }
 0x184   :  { %1193 = vpow2.f32 %v568_v22  ;;  %v1040_v47 = vadd.f32 -1.0, %v1192_v45  ;;  %v632_v57 = vmul.f32 0.0, %v630_v36  ;;  %v1311_v22 = vmov 50  }
 0x186   :  { %v572_v25 = vsel %vm562_vm15, %v560_v24, %v1040_v47 }
 0x187   :  { %576 = vrot.lane.b32.xlu0 %v572_v25, %s1298_s26 }
 0x188   :  { %v664_v62 = vpop.permute.xlu1 %663 }
 0x18b   :  { %697 = vperm.xlu0 %1174, %v1335_v0  }
 0x18d   :  { %v681_v42 = vpop.permute.xlu1 %680 }
 0x18e   :  { %v1194_v49 = vpop.eup %1193  ;;  %v683_v46 = vmul.f32 0.0, %v681_v42 }
 0x18f   :  { %1177 = vset.pattern.permute.xlu0 %v1299_v27  ;;  %v1041_v50 = vadd.f32 -1.0, %v1194_v49 }
 0x190   :  { %744 = vperm.xlu0 %1177, %v1335_v0  }
 0x191   :  { %v573_v51 = vsel %vm563_vm10, %v561_v44, %v1041_v50  ;;  %v1309_v44 = vmov 53  }
 0x192   :  { %578 = vrot.lane.b32.xlu1 %v573_v51, %s1298_s26 }
 0x194   :  { %1180 = vset.pattern.permute.xlu0 %v1300_v31 }
 0x195   :  { %795 = vperm.xlu0 %1180, %v1335_v0  }
 0x196   :  { %710 = vperm.xlu1 %1175, %v1335_v0  }
 0x199   :  { %602 = vrot.lane.b32.xlu0 %v598_v55, %s1261_s13 }
 0x19a   :  { %1176 = vset.pattern.permute.xlu1 %v1301_v56  ;;  %1184 = vset.pattern.permute.xlu0 %v1307_v38 }
 0x19b   :  { %727 = vperm.xlu1 %1176, %v1335_v0   ;;  %v666_v0 = vmul.f32 0.0, %v664_v62 }
 0x19d   :  { %619 = vrot.lane.b32.xlu0 %v615_v33, %s1262_s14 }
 0x19f   :  { %1178 = vset.pattern.permute.xlu1 %v1302_v59 }
 0x1a0   :  { %761 = vperm.xlu1 %1178, %v1551_v61  }
 0x1a1   :  { %636 = vrot.lane.b32.xlu0 %v632_v57, %s1263_s0 }
 0x1a4   :  { %1179 = vset.pattern.permute.xlu1 %v1303_v39 }
 0x1a5   :  { %778 = vperm.xlu1 %1179, %v1551_v61   ;;  %653 = vrot.lane.b32.xlu0 %v649_v63, %s1264_s15 }
 0x1a9   :  { %1181 = vset.pattern.permute.xlu1 %v1304_v1  ;;  %670 = vrot.lane.b32.xlu0 %v666_v0, %s1265_s16 }
 0x1aa   :  { %812 = vperm.xlu1 %1181, %v1551_v61  }
 0x1ad   :  { %687 = vrot.lane.b32.xlu0 %v683_v46, %s1266_s17 }
 0x1ae   :  { %1182 = vset.pattern.permute.xlu1 %v1305_v48 }
 0x1af   :  { %587 = vperm.xlu1 %1182, %v1551_v61  }
 0x1b3   :  { %1183 = vset.pattern.permute.xlu1 %v1306_v2 }
 0x1f9   :  { %v577_v6 = vpop.permute.xlu0 %576 }
 0x204   :  { %v579_v9 = vpop.permute.xlu1 %578 }
 0x205   :  { %v1561_v52 = vsel %vm580_vm6, %v577_v6, %v579_v9 }
 0x206   :  { %v599_v54 = vmul.f32 %v596_v29, %v1561_v52  ;;  %v616_v41 = vmul.f32 %v613_v53, %v1561_v52  ;;  %v633_v3 = vmul.f32 %v630_v36, %v1561_v52  ;;  %v650_v10 = vmul.f32 %v647_v34, %v1561_v52 }
 0x207   :  { %v667_v13 = vmul.f32 %v664_v62, %v1561_v52  ;;  %v684_v7 = vmul.f32 %v681_v42, %v1561_v52 }
 0x208   :  { %604 = vrot.lane.b32.xlu1 %v599_v54, %s1261_s13 }
 0x20a   :  { %v698_v5 = vpop.permute.xlu0 %697 }
 0x20b   :  { %v700_v21 = vmul.f32 %v698_v5, %v1561_v52 }
 0x20c   :  { %621 = vrot.lane.b32.xlu1 %v616_v41, %s1262_s14 }
 0x20f   :  { %v745_v16 = vpop.permute.xlu0 %744 }
 0x210   :  { %638 = vrot.lane.b32.xlu1 %v633_v3, %s1263_s0  ;;  %v748_v12 = vmul.f32 0.0, %v745_v16  ;;  %v747_v30 = vmul.f32 %v745_v16, %v1561_v52 }
 0x214   :  { %655 = vrot.lane.b32.xlu1 %v650_v10, %s1264_s15  ;;  %v796_v14 = vpop.permute.xlu0 %795 }
 0x215   :  { %v711_v58 = vpop.permute.xlu1 %710  ;;  %v799_v19 = vmul.f32 0.0, %v796_v14  ;;  %v798_v35 = vmul.f32 %v796_v14, %v1561_v52 }
 0x216   :  { %v714_v60 = vmul.f32 0.0, %v711_v58  ;;  %v713_v24 = vmul.f32 %v711_v58, %v1561_v52 }
 0x218   :  { %672 = vrot.lane.b32.xlu1 %v667_v13, %s1265_s16  ;;  %719 = vrot.lane.b32.xlu0 %v714_v60, %s1268_s19  ;;  %v603_v45 = vpop.permute.xlu0 %602 }
 0x21a   :  { %v728_v4 = vpop.permute.xlu1 %727 }
 0x21b   :  { %v731_v18 = vmul.f32 0.0, %v728_v4  ;;  %v730_v28 = vmul.f32 %v728_v4, %v1561_v52 }
 0x21c   :  { %689 = vrot.lane.b32.xlu1 %v684_v7, %s1266_s17  ;;  %v620_v47 = vpop.permute.xlu0 %619 }
 0x21d   :  { %736 = vrot.lane.b32.xlu0 %v731_v18, %s1269_s20 }
 0x21f   :  { %v762_v8 = vpop.permute.xlu1 %761 }
 0x220   :  { %830 = vperm.xlu1 %1183, %v1551_v61   ;;  %v765_v23 = vmul.f32 0.0, %v762_v8  ;;  %v764_v15 = vmul.f32 %v762_v8, %v1561_v52  ;;  %v637_v49 = vpop.permute.xlu0 %636 }
 0x221   :  { %753 = vrot.lane.b32.xlu0 %v748_v12, %s1270_s21 }
 0x224   :  { %804 = vrot.lane.b32.xlu1 %v799_v19, %s1273_s24  ;;  %v779_v26 = vpop.permute.xlu1 %778  ;;  %v654_v50 = vpop.permute.xlu0 %653 }
 0x225   :  { %702 = vrot.lane.b32.xlu0 %v700_v21, %s1267_s18  ;;  %v782_v11 = vmul.f32 0.0, %v779_v26  ;;  %v781_v40 = vmul.f32 %v779_v26, %v1561_v52  ;;  %1185 = vset.pattern.permute.xlu1 %v1308_v43 }
 0x228   :  { %717 = vrot.lane.b32.xlu1 %v713_v24, %s1268_s19  ;;  %v671_v29 = vpop.permute.xlu0 %670 }
 0x229   :  { %770 = vrot.lane.b32.xlu0 %v765_v23, %s1271_s22  ;;  %v813_v37 = vpop.permute.xlu1 %812 }
 0x22a   :  { %v815_v32 = vmul.f32 %v813_v37, %v1561_v52  ;;  %v816_v17 = vmul.f32 0.0, %v813_v37 }
 0x22c   :  { %734 = vrot.lane.b32.xlu1 %v730_v28, %s1269_s20  ;;  %v688_v53 = vpop.permute.xlu0 %687 }
 0x22d   :  { %787 = vrot.lane.b32.xlu0 %v782_v11, %s1272_s23 }
 0x22e   :  { %v588_v25 = vpop.permute.xlu1 %587 }
 0x22f   :  { %v590_v34 = vmul.f32 0.0, %v588_v25  ;;  %v591_v39 = vmul.f32 %v588_v25, %v1561_v52 }
 0x230   :  { %751 = vrot.lane.b32.xlu1 %v747_v30, %s1270_s21 }
 0x231   :  { %802 = vrot.lane.b32.xlu0 %v798_v35, %s1273_s24 }
 0x234   :  { %768 = vrot.lane.b32.xlu1 %v764_v15, %s1271_s22 }
 0x235   :  { %819 = vrot.lane.b32.xlu0 %v815_v32, %s1274_s25 }
 0x238   :  { %785 = vrot.lane.b32.xlu1 %v781_v40, %s1272_s23 }
 0x239   :  { %868 = vperm.xlu0 %1184, %v1551_v61  }
 0x23c   :  { %821 = vrot.lane.b32.xlu1 %v816_v17, %s1274_s25 }
 0x23d   :  { %1187 = vset.pattern.permute.xlu0 %v1310_v20 }
 0x240   :  { %885 = vperm.xlu1 %1185, %v1551_v61  }
 0x244   :  { %1186 = vset.pattern.permute.xlu1 %v1309_v44 }
 0x245   :  { %898 = vperm.xlu1 %1186, %v1551_v61  }
 0x249   :  { %1188 = vset.pattern.permute.xlu1 %v1311_v22 }
 0x27a   :  { %v605_v27 = vpop.permute.xlu1 %604 }
 0x27b   :  { %v606_v62 = vsel %vm51_vm0, %v603_v45, %v605_v27  ;;  %v610_v1 = vadd.f32 %v605_v27, %v591_v39 }
 0x27c   :  { %v609_v42 = vadd.f32 %v606_v62, %v590_v34 }
 0x27e   :  { %v622_v51 = vpop.permute.xlu1 %621 }
 0x27f   :  { %v623_v0 = vsel %vm69_vm1, %v620_v47, %v622_v51  ;;  %v627_v9 = vadd.f32 %v622_v51, %v610_v1  ;;  %vm1646_vm1 = vcmask 957440  }
 0x280   :  { %v626_v6 = vadd.f32 %v623_v0, %v609_v42 }
 0x282   :  { %v639_v31 = vpop.permute.xlu1 %638 }
 0x283   :  { %v640_v46 = vsel %vm87_vm2, %v637_v49, %v639_v31  ;;  %v644_v3 = vadd.f32 %v639_v31, %v627_v9 }
 0x284   :  { %v643_v41 = vadd.f32 %v640_v46, %v626_v6  ;;  %v1313_v6 = vmov 4  }
 0x286   :  { %v656_v55 = vpop.permute.xlu1 %655 }
 0x287   :  { %v657_v54 = vsel %vm105_vm3, %v654_v50, %v656_v55  ;;  %v661_v60 = vadd.f32 %v656_v55, %v644_v3 }
 0x288   :  { %v660_v58 = vadd.f32 %v657_v54, %v643_v41 }
 0x28a   :  { %v720_v33 = vpop.permute.xlu0 %719  ;;  %v673_v56 = vpop.permute.xlu1 %672 }
 0x28b   :  { %v674_v10 = vsel %vm123_vm4, %v671_v29, %v673_v56  ;;  %v678_v4 = vadd.f32 %v673_v56, %v661_v60  ;;  %vm1647_vm4 = vcmask 949248  }
 0x28c   :  { %v677_v16 = vadd.f32 %v674_v10, %v660_v58 }
 0x28e   :  { %v690_v57 = vpop.permute.xlu1 %689 }
 0x28f   :  { %v737_v36 = vpop.permute.xlu0 %736  ;;  %v691_v52 = vsel %vm141_vm5, %v688_v53, %v690_v57  ;;  %v695_v12 = vadd.f32 %v690_v57, %v678_v4  ;;  %vm823_vm5 = vcmask 932864  }
 0x290   :  { %v694_v18 = vadd.f32 %v691_v52, %v677_v16 }
 0x293   :  { %v754_v59 = vpop.permute.xlu0 %753 }
 0x297   :  { %v703_v48 = vpop.permute.xlu0 %702 }
 0x298   :  { %v705_v14 = vadd.f32 %v703_v48, %v694_v18  ;;  %v706_v8 = vadd.f32 %v703_v48, %v695_v12 }
 0x29b   :  { %v771_v13 = vpop.permute.xlu0 %770 }
 0x29f   :  { %v831_v63 = vpop.permute.xlu1 %830  ;;  %v788_v21 = vpop.permute.xlu0 %787 }
 0x2a3   :  { %v805_v2 = vpop.permute.xlu1 %804  ;;  %v803_v32 = vpop.permute.xlu0 %802 }
 0x2a7   :  { %v718_v5 = vpop.permute.xlu1 %717  ;;  %v820_v49 = vpop.permute.xlu0 %819 }
 0x2a8   :  { %v721_v19 = vsel %vm177_vm7, %v718_v5, %v720_v33  ;;  %v724_v24 = vadd.f32 %v718_v5, %v705_v14  ;;  %vm1648_vm7 = vcmask 941056  }
 0x2a9   :  { %v725_v11 = vadd.f32 %v721_v19, %v706_v8  ;;  %v806_v47 = vsel %vm1648_vm7, %v803_v32, %v805_v2 }
 0x2ab   :  { %v735_v7 = vpop.permute.xlu1 %734 }
 0x2ac   :  { %v738_v26 = vsel %vm195_vm8, %v735_v7, %v737_v36  ;;  %v741_v28 = vadd.f32 %v735_v7, %v724_v24 }
 0x2ad   :  { %v742_v35 = vadd.f32 %v738_v26, %v725_v11 }
 0x2af   :  { %v752_v23 = vpop.permute.xlu1 %751 }
 0x2b0   :  { %v755_v30 = vsel %vm213_vm9, %v752_v23, %v754_v59  ;;  %v758_v15 = vadd.f32 %v752_v23, %v741_v28 }
 0x2b1   :  { %v759_v40 = vadd.f32 %v755_v30, %v742_v35 }
 0x2b3   :  { %v769_v37 = vpop.permute.xlu1 %768 }
 0x2b4   :  { %v772_v38 = vsel %vm1646_vm1, %v769_v37, %v771_v13  ;;  %v775_v17 = vadd.f32 %v769_v37, %v758_v15 }
 0x2b5   :  { %v776_v43 = vadd.f32 %v772_v38, %v759_v40 }
 0x2b7   :  { %v786_v44 = vpop.permute.xlu1 %785 }
 0x2b8   :  { %v789_v20 = vsel %vm1647_vm4, %v786_v44, %v788_v21  ;;  %v792_v22 = vadd.f32 %v786_v44, %v775_v17 }
 0x2b9   :  { %v793_v45 = vadd.f32 %v789_v20, %v776_v43 }
 0x2ba   :  { %v809_v25 = vadd.f32 %v803_v32, %v792_v22 }
 0x2bb   :  { %v822_v27 = vpop.permute.xlu1 %821  ;;  %v810_v50 = vadd.f32 %v806_v47, %v793_v45 }
 0x2bc   :  { %v827_v51 = vadd.f32 %v820_v49, %v809_v25  ;;  %v824_v29 = vsel %vm823_vm5, %v820_v49, %v822_v27  ;;  %v1314_v27 = vmov 1983009808  }
 0x2bd   :  { %v828_v31 = vadd.f32 %v824_v29, %v810_v50  ;;  %v979_v50 = vunpack.c.l.s4 %v1314_v27  ;;  %v981_v29 = vlaneseq }
 0x2be   :  { %v833_v53 = vadd.f32 %v831_v63, %v827_v51 }
 0x2bf   :  { %v834_v55 = vadd.f32 %v831_v63, %v828_v31  ;;  %v886_v59 = vpop.permute.xlu1 %885  ;;  %v869_v63 = vpop.permute.xlu0 %868 }
 0x2c0   :  { %v837_v33 = vmin.f32 %v833_v53, 0.0  ;;  %vm835_vm8 = vcmp.gt.f32.partialorder %v833_v53, 0.0  ;;  %v871_v2 = vmul.f32 0.0, %v869_v63 }
 0x2c1   :  { %v838_v56 = vmin.f32 %v834_v55, 0.0  ;;  %vm836_vm9 = vcmp.gt.f32.partialorder %v834_v55, 0.0 }
 0x2c2   :  { %v839_v36 = vmul.f32 1.442695, %v837_v33 }
 0x2c3   :  { %v841_v57 = vmul.f32 1.442695, %v838_v56 }
 0x2c4   :  { %1195 = vpow2.f32 %v839_v36  ;;  %v899_v46 = vpop.permute.xlu1 %898 }
 0x2c5   :  { %1197 = vpow2.f32 %v841_v57  ;;  %v902_v48 = vmul.f32 0.0, %v899_v46  ;;  %v980_v57 = vunpack.c.0.s8 %v979_v50 }
 0x2ce   :  { %v1196_v34 = vpop.eup %1195 }
 0x2cf   :  { %v1198_v62 = vpop.eup %1197  ;;  %v1042_v39 = vadd.f32 -1.0, %v1196_v34 }
 0x2d0   :  { %v1043_v0 = vadd.f32 -1.0, %v1198_v62  ;;  %v982_v62 = vshrl.u32 %v981_v29, 7 }
 0x2d1   :  { %v845_v42 = vsel %vm835_vm8, %v833_v53, %v1042_v39 }
 0x2d2   :  { %849 = vrot.lane.b32.xlu0 %v845_v42, %s1312_s1  ;;  %v846_v1 = vsel %vm836_vm9, %v834_v55, %v1043_v0 }
 0x2d3   :  { %851 = vrot.lane.b32.xlu1 %v846_v1, %s1312_s1 }
 0x2d6   :  { %915 = vperm.xlu0 %1187, %v1551_v61  }
 0x2d7   :  { %860 = vperm.xlu1 %1188, %v1551_v61  }
 0x2da   :  { %907 = vrot.lane.b32.xlu0 %v902_v48, %s1263_s0 }
 0x2db   :  { %875 = vrot.lane.b32.xlu1 %v871_v2, %s1261_s13  ;;  %1190 = vset.pattern.permute.xlu0 %v1313_v6 }
 0x2dc   :  { %1189 = vset.pattern.permute.xlu1 %v1313_v6 }
 0x2df   :  { %932 = vperm.xlu1 %1189, %v1551_v61  }
 0x344   :  { %v850_v9 = vpop.permute.xlu0 %849 }
 0x345   :  { %v852_v54 = vpop.permute.xlu1 %851 }
 0x346   :  { %v854_v41 = vsel %vm853_vm12, %v850_v9, %v852_v54  ;;  %v983_v54 = vsub.s32 %v980_v57, %v982_v62 }
 0x347   :  { %v901_v3 = vmul.f32 %v899_v46, %v854_v41  ;;  %v872_v10 = vmul.f32 %v869_v63, %v854_v41  ;;  %v888_v5 = vmul.f32 %v886_v59, %v854_v41 }
 0x349   :  { %905 = vrot.lane.b32.xlu1 %v901_v3, %s1263_s0  ;;  %877 = vrot.lane.b32.xlu0 %v872_v10, %s1261_s13  ;;  %s1315_s13 = smov 2  }
 0x34d   :  { %890 = vrot.lane.b32.xlu0 %v888_v5, %s1262_s14  ;;  %s1316_s14 = smov [#allocation3]  }
 0x34e   :  { %s1032_s0 = sshll.u32 %s1316_s14, 4  ;;  %s1033_s0 = int_to_ptr.vmem [resolvable:$true] %s1032_s0 }
 0x34f   :  { %p1209_p1 = scmp.lt.s32.totalorder %s1033_s0, %s1033_s0 }
 0x355   :  { %v916_v58 = vpop.permute.xlu0 %915 }
 0x356   :  { %v918_v60 = vmul.f32 %v916_v58, %v854_v41  ;;  %v919_v52 = vmul.f32 0.0, %v916_v58  ;;  %v861_v13 = vpop.permute.xlu1 %860 }
 0x357   :  { %v863_v7 = vmul.f32 0.0, %v861_v13  ;;  %v864_v19 = vmul.f32 %v861_v13, %v854_v41 }
 0x358   :  { %922 = vrot.lane.b32.xlu1 %v918_v60, %s1264_s15  ;;  %924 = vrot.lane.b32.xlu0 %v919_v52, %s1264_s15  ;;  %s1204_s15 = scalar_lea.vmem %s1033_s0, 96 }
 0x359   :  { %v908_v61 = vpop.permute.xlu0 %907  ;;  %p1205_p0 = scmp.ne.s32.totalorder %s1033_s0, %s1204_s15  ;;  %p1210_p2 = scmp.lt.s32.totalorder %s1204_s15, %s1204_s15 }
 0x35a   :  { %v876_v4 = vpop.permute.xlu1 %875 }
 0x35b   :  { %p1211_p3 = por %p1210_p2, %p1209_p1 }
 0x35d   :  { %p1212_p4 = pnand %p1211_p3, %p1205_p0 }
 0x35e   :  { %v933_v12 = vpop.permute.xlu1 %932 }
 0x3bb   :  { %v878_v16 = vpop.permute.xlu0 %877  ;;  %v906_v24 = vpop.permute.xlu1 %905 }
 0x3bc   :  { %v879_v18 = vsel %vm51_vm0, %v876_v4, %v878_v16  ;;  %v883_v21 = vadd.f32 %v878_v16, %v864_v19  ;;  %v909_v11 = vsel %vm87_vm2, %v906_v24, %v908_v61 }
 0x3bd   :  { %v882_v14 = vadd.f32 %v879_v18, %v863_v7 }
 0x3bf   :  { %v891_v8 = vpop.permute.xlu0 %890 }
 0x3c0   :  { %v893_v23 = vadd.f32 %v891_v8, %v882_v14  ;;  %v894_v26 = vadd.f32 %v891_v8, %v883_v21 }
 0x3c2   :  { %v912_v28 = vadd.f32 %v906_v24, %v893_v23  ;;  %v913_v30 = vadd.f32 %v909_v11, %v894_v26 }
 0x3ca   :  { %v923_v35 = vpop.permute.xlu1 %922  ;;  %v925_v37 = vpop.permute.xlu0 %924 }
 0x3cb   :  { %v929_v15 = vadd.f32 %v923_v35, %v912_v28  ;;  %v926_v38 = vsel %vm105_vm3, %v923_v35, %v925_v37  ;;  %vm988_vm3 = vcmask 15360  }
 0x3cc   :  { %v930_v32 = vadd.f32 %v926_v38, %v913_v30 }
 0x3cd   :  { %v935_v40 = vadd.f32 %v933_v12, %v929_v15 }
 0x3ce   :  { %v936_v17 = vadd.f32 %v933_v12, %v930_v32 }
 0x3cf   :  { %v939_v43 = vmin.f32 %v935_v40, 0.0  ;;  %vm937_vm0 = vcmp.gt.f32.partialorder %v935_v40, 0.0 }
 0x3d0   :  { %v940_v44 = vmin.f32 %v936_v17, 0.0  ;;  %vm938_vm2 = vcmp.gt.f32.partialorder %v936_v17, 0.0 }
 0x3d1   :  { %v941_v20 = vmul.f32 1.442695, %v939_v43 }
 0x3d2   :  { %v943_v22 = vmul.f32 1.442695, %v940_v44 }
 0x3d3   :  { %1199 = vpow2.f32 %v941_v20 }
 0x3d4   :  { %1201 = vpow2.f32 %v943_v22 }
 0x3dd   :  { %v1200_v45 = vpop.eup %1199 }
 0x3de   :  { %v1202_v47 = vpop.eup %1201  ;;  %v1044_v25 = vadd.f32 -1.0, %v1200_v45 }
 0x3df   :  { %v1045_v49 = vadd.f32 -1.0, %v1202_v47 }
 0x3e0   :  { %v947_v51 = vsel %vm937_vm0, %v935_v40, %v1044_v25 }
 0x3e1   :  { %v951_v31 = vrot.slane %v947_v51, 2  ;;  %v948_v53 = vsel %vm938_vm2, %v936_v17, %v1045_v49  ;;  %v959_v36 = vrot.slane %v947_v51, 4  ;;  %v967_v42 = vrot.slane %v947_v51, 6 }
 0x3e2   :  { %v952_v55 = vrot.slane %v948_v53, 2  ;;  %v960_v34 = vrot.slane %v948_v53, 4  ;;  %v968_v63 = vrot.slane %v948_v53, 6 }
 0x3e3   :  { %v955_v33 = vadd.f32 %v951_v31, %v947_v51  ;;  %v957_v56 = vmax.f32 %v947_v51, %v951_v31 }
 0x3e4   :  { %v958_v59 = vmax.f32 %v948_v53, %v952_v55  ;;  %v956_v39 = vadd.f32 %v952_v55, %v948_v53 }
 0x3e5   :  { %v965_v0 = vmax.f32 %v957_v56, %v959_v36  ;;  %v963_v1 = vadd.f32 %v959_v36, %v955_v33 }
 0x3e6   :  { %v966_v46 = vmax.f32 %v958_v59, %v960_v34  ;;  %v964_v48 = vadd.f32 %v960_v34, %v956_v39 }
 0x3e7   :  { %v973_v2 = vmax.f32 %v965_v0, %v967_v42  ;;  %v971_v6 = vadd.f32 %v967_v42, %v963_v1 }
 0x3e8   :  { %v974_v9 = vmax.f32 %v966_v46, %v968_v63  ;;  %v972_v41 = vadd.f32 %v968_v63, %v964_v48 }
 0x3e9   :  { %v1008_v3 = vmul.f32 0.25, %v971_v6 }
 0x3ea   :  { %v994_v10 = vcombine.low %v973_v2, %v974_v9  ;;  %v977_v5 = vcombine.low %v971_v6, %v972_v41  ;;  %v1009_v58 = vmul.f32 0.25, %v972_v41 }
 0x3ec   :  { %v1001_v60 = vrot.slane %v994_v10, %v983_v54  ;;  %v984_v52 = vrot.slane %v977_v5, %v983_v54  ;;  %v1012_v61 = vcombine.low %v1008_v3, %v1009_v58 }
 0x3ee   :  { %1002 = vrot.lane.b32.xlu0 %v1001_v60, %s1315_s13  ;;  %985 = vrot.lane.b32.xlu1 %v984_v52, %s1315_s13  ;;  %v1019_v13 = vrot.slane %v1012_v61, %v983_v54 }
 0x3f2   :  { %1020 = vrot.lane.b32.xlu1 %v1019_v13, %s1315_s13 }
 0x460   :  { %v1003_v16 = vpop.permute.xlu0 %1002  ;;  %v986_v4 = vpop.permute.xlu1 %985 }
 0x461   :  { %v1004_v7 = vrot.slane %v1003_v16, 2  ;;  %v987_v18 = vrot.slane %v986_v4, 2 }
 0x463   :  { %v1005_v12 = vsel %vm988_vm3, %v1003_v16, %v1004_v7  ;;  %v989_v14 = vsel %vm988_vm3, %v986_v4, %v987_v18 }
 0x464   :  { %1007 = vst [vmem:[#allocation3 + $0x2] sm:$0x3] %v1005_v12  ;;  %991 = vst [vmem:[#allocation3] sm:$0x3] %v989_v14  ;;  %v1021_v19 = vpop.permute.xlu1 %1020 }
 0x465   :  { %v1022_v8 = vrot.slane %v1021_v19, 2 }
 0x467   :  { %v1023_v21 = vsel %vm988_vm3, %v1021_v19, %v1022_v8 }
 0x468   :  { %1025 = vst [vmem:[#allocation3 + $0x4] sm:$0x3] %v1023_v21 }
 0x469   :  { %1215 = shalt.err (!%p1212_p4)
}
 0x46a   :  { %s1216_s18 = scalar_lea.hbm %s1642_s2, 96 }
 0x46b   :  { %p1217_p5 = scmp.ne.s32.totalorder %s1642_s2, %s1216_s18  ;;  %p1220_p6 = scmp.lt.u32.totalorder %s1216_s18, %s1642_s2 }
 0x46d   :  { %p1222_p7 = pnand %p1220_p6, %p1217_p5 }
 0x46f   :  { %1225 = shalt.err (!%p1222_p7)
}
 0x470   :  { %1035 = dma.vmem_to_hbm [thread:$0]  %s1033_s0, 96, %s1642_s2, [#allocation4]  }
 0x471   :  { %1226 = dma.done.wait [#allocation4], 96  }
 0x472   :  { %1227 = vsyncadd [#allocation4], 4294967200 }
 0x473   :  { %1039 = vsyncpa [#allocation4], 1 }

</bundles_post_ra>
